<compile_context>
chip_gen: v7x
topology: tpu7x:2x2x1
jax: 0.10.0
libtpu: 0.0.40
codegen_flags: <defaults>
</compile_context>

<pallas_src>
import functools

import jax
import jax.numpy as jnp
from jax import lax
from jax.experimental import pallas as pl
from jax.experimental.pallas import tpu as pltpu


def _row_shift(x, dr):
    """out[i, :] = x[i + dr, :] where in-bounds, zero-padded otherwise."""
    if dr == 0:
        return x
    n = x.shape[0]
    # pltpu.roll requires a non-negative (static) shift: use the cyclic
    # equivalent (-dr) % n, then zero out the wrapped-around rows.
    y = pltpu.roll(x, shift=(-dr) % n, axis=0)            # XLU sublane rotate
    rows = lax.broadcasted_iota(jnp.int32, x.shape, 0)
    mask = rows < (n - dr) if dr > 0 else rows >= (-dr)
    return jnp.where(mask, y, 0.0)


def cpi_kernel(cb_ref, x_fp_ref, adj_ref, x_w_ref,
               wg_ref, bg_ref, cmix_ref, wa_ref, ba_ref,
               wotop_ref, wobot_ref, wofull_ref, bo_ref,
               wi_ref, bi_ref,
               out_ref, stk_ref,
               *, layer_gnn, layer_cnn, layer_output, window, dim):
    f32 = jnp.float32
    bf16 = jnp.bfloat16
    ksize = 2 * window + 1

    # ---------------- GNN over fingerprint vectors (shared weights) ----------------
    xs = x_fp_ref[0]                              # (Na, dim) f32
    adj = adj_ref[0].astype(bf16)                 # (Na, Na)
    wg_t = wg_ref[...]                            # (dim, dim) bf16
    bg = bg_ref[...]                              # (1, dim)  f32
    for _ in range(layer_gnn):
        hs = jnp.maximum(
            jnp.dot(xs.astype(bf16), wg_t, preferred_element_type=f32) + bg, 0.0)
        xs = xs + jnp.dot(adj, hs.astype(bf16), preferred_element_type=f32)
    compound = jnp.mean(xs, axis=0, keepdims=True)            # (1, dim) f32

    # ------------- CNN: conv2d as ONE fused matmul + sublane roll-accumulate -------------
    ws = x_w_ref[0]                               # (Nw, dim) f32
    cmix = cmix_ref[...]                          # (dim, ksize*dim) bf16
    cb = cb_ref[0]                                # scalar conv bias (SMEM)
    for _ in range(layer_cnn):                    # shared conv weights
        y = jnp.dot(ws.astype(bf16), cmix, preferred_element_type=f32)   # (Nw, ksize*dim)
        acc = None
        for p in range(ksize):
            yp = _row_shift(y[:, p * dim:(p + 1) * dim], p - window)
            acc = yp if acc is None else acc + yp
        ws = jnp.maximum(acc + cb, 0.0)

    # ---------------- attention: fused projection of [compound ; ws] ----------------
    stk_ref[0:8, :] = jnp.broadcast_to(compound, (8, dim))    # 8-row aligned pad
    stk_ref[8:, :] = ws
    proj = jnp.maximum(
        jnp.dot(stk_ref[...].astype(bf16), wa_ref[...],
                preferred_element_type=f32) + ba_ref[...], 0.0)
    h = proj[0:1, :]                              # (1, dim)
    hs = proj[8:, :]                              # (Nw, dim)
    # tanh(F.linear(h, hs)).T == tanh(hs @ h.T), done as a lane reduction (VPU/XLU).
    weights = jnp.tanh(jnp.sum(hs * h, axis=1, keepdims=True))   # (Nw, 1)
    protein = jnp.mean(weights * hs, axis=0, keepdims=True)      # (1, dim)

    # ------------- output MLP (concat realized as pre-split matmul; shared weights) -------------
    bo = bo_ref[...]
    cat = jnp.maximum(
        jnp.dot(compound.astype(bf16), wotop_ref[...], preferred_element_type=f32)
        + jnp.dot(protein.astype(bf16), wobot_ref[...], preferred_element_type=f32)
        + bo, 0.0)
    for _ in range(layer_output - 1):
        cat = jnp.maximum(
            jnp.dot(cat.astype(bf16), wofull_ref[...], preferred_element_type=f32)
            + bo, 0.0)
    # lane-dense (1, 128) output: Wi padded to 128 columns in glue, sliced in wrapper.
    out_ref[0] = (jnp.dot(cat.astype(bf16), wi_ref[...], preferred_element_type=f32)
                  + bi_ref[...])


def cpi_forward(params, fingerprints, adjacency, words,
                *, layer_gnn, layer_cnn, layer_output, window):
    assert layer_output >= 1
    f32, bf16 = jnp.float32, jnp.bfloat16
    dim = params["Wg"].shape[0]
    ksize = 2 * window + 1
    B, n_atoms = fingerprints.shape
    _, n_words = words.shape
    assert n_words % 8 == 0, "n_words must be a multiple of 8 (sublane alignment)"

    # ---- glue: embedding gathers (data-dependent) + parameter layout transforms ----
    x_fp = jnp.take(params["E_fp"], fingerprints, axis=0).astype(f32)   # (B, Na, dim)
    x_w = jnp.take(params["E_word"], words, axis=0).astype(f32)         # (B, Nw, dim)
    adj = adjacency.astype(f32)                                         # (B, Na, Na)

    # Per-tap banded column-mix matrices, fused into a single (dim, ksize*dim) operand.
    cmix = jnp.concatenate(
        [sum(params["conv_w"][p, q] * jnp.eye(dim, k=window - q, dtype=f32)
             for q in range(ksize))
         for p in range(ksize)], axis=1).astype(bf16)

    wg_t = params["Wg"].T.astype(bf16)
    wa_t = params["Wa"].T.astype(bf16)
    wo_t = params["Wo"].T.astype(bf16)            # (2*dim, 2*dim)
    wo_top, wo_bot = wo_t[:dim, :], wo_t[dim:, :]  # pre-split in glue (free)
    wi_pad = jnp.zeros((2 * dim, 128), bf16).at[:, :2].set(params["Wi"].T.astype(bf16))
    bi_pad = jnp.zeros((1, 128), f32).at[:, :2].set(params["bi"][None, :])

    bg = params["bg"][None, :].astype(f32)
    ba = params["ba"][None, :].astype(f32)
    bo = params["bo"][None, :].astype(f32)
    cb = params["conv_b"].reshape(1).astype(f32)

    kernel = functools.partial(
        cpi_kernel, layer_gnn=layer_gnn, layer_cnn=layer_cnn,
        layer_output=layer_output, window=window, dim=dim)

    def per_sample(shape):
        return pl.BlockSpec((1,) + shape, lambda b: (b,) + (0,) * len(shape))

    def shared(shape):
        return pl.BlockSpec(shape, lambda b: (0,) * len(shape))

    in_specs = [
        pl.BlockSpec(memory_space=pltpu.MemorySpace.SMEM),   # conv bias scalar
        per_sample((n_atoms, dim)),                          # x_fp
        per_sample((n_atoms, n_atoms)),                      # adjacency
        per_sample((n_words, dim)),                          # x_w
        shared((dim, dim)),                                  # Wg.T
        shared((1, dim)),                                    # bg
        shared((dim, ksize * dim)),                          # cmix (fused conv col-mix)
        shared((dim, dim)),                                  # Wa.T
        shared((1, dim)),                                    # ba
        shared((dim, 2 * dim)),                              # Wo.T top half
        shared((dim, 2 * dim)),                              # Wo.T bottom half
        shared((2 * dim, 2 * dim)),                          # Wo.T full
        shared((1, 2 * dim)),                                # bo
        shared((2 * dim, 128)),                              # Wi.T (lane-padded)
        shared((1, 128)),                                    # bi (lane-padded)
    ]

    out = pl.pallas_call(
        kernel,
        out_shape=jax.ShapeDtypeStruct((B, 1, 128), f32),
        grid=(B,),
        in_specs=in_specs,
        out_specs=pl.BlockSpec((1, 1, 128), lambda b: (b, 0, 0)),
        scratch_shapes=[pltpu.VMEM((8 + n_words, dim), f32)],
        compiler_params=pltpu.CompilerParams(
            dimension_semantics=("parallel",)),
    )(cb, x_fp, adj, x_w, wg_t, bg, cmix, wa_t, ba,
      wo_top, wo_bot, wo_t, bo, wi_pad, bi_pad)

    return out[:, 0, :2]                                     # (B, 2)


# ---------------- pure-JAX reference (mirrors the PyTorch forward, per sample) ----------------
def cpi_reference(params, fingerprints, adjacency, words,
                  *, layer_gnn, layer_cnn, layer_output, window):
    def single(fp, adj, wd):
        x = params["E_fp"][fp]
        for _ in range(layer_gnn):
            hs = jax.nn.relu(x @ params["Wg"].T + params["bg"])
            x = x + adj @ hs
        compound = jnp.mean(x, axis=0, keepdims=True)

        ws = params["E_word"][wd]
        ksize = 2 * window + 1
        n_words, dim = ws.shape
        for _ in range(layer_cnn):
            padded = jnp.pad(ws, ((window, window), (window, window)))
            out = jnp.zeros_like(ws)
            for p in range(ksize):
                for q in range(ksize):
                    out = out + params["conv_w"][p, q] * padded[p:p + n_words,
                                                                q:q + dim]
            ws = jax.nn.relu(out + params["conv_b"])

        h = jax.nn.relu(compound @ params["Wa"].T + params["ba"])
        hs = jax.nn.relu(ws @ params["Wa"].T + params["ba"])
        weights = jnp.tanh(h @ hs.T)                 # (1, Nw)
        ys = weights.T * hs
        protein = jnp.mean(ys, axis=0, keepdims=True)

        cat = jnp.concatenate([compound, protein], axis=1)
        for _ in range(layer_output):
            cat = jax.nn.relu(cat @ params["Wo"].T + params["bo"])
        return cat @ params["Wi"].T + params["bi"]

    outs = [single(fingerprints[b], adjacency[b], words[b])
            for b in range(fingerprints.shape[0])]
    return jnp.concatenate(outs, axis=0)


def init_params(key, n_fingerprint, n_word, dim, window, layer_gnn):
    ksize = 2 * window + 1
    keys = jax.random.split(key, 12)

    def rnd(k, shape):
        return (0.1 * jax.random.normal(k, shape)).astype(jnp.float32)

    e_fp = rnd(keys[0], (n_fingerprint, dim))
    # nn.Embedding(n_fingerprint, dim, padding_idx=layer_gnn): that row is zero.
    e_fp = e_fp.at[layer_gnn].set(0.0)
    return dict(
        E_fp=e_fp,
        E_word=rnd(keys[1], (n_word, dim)),
        Wg=rnd(keys[2], (dim, dim)), bg=rnd(keys[3], (dim,)),
        conv_w=rnd(keys[4], (ksize, ksize)), conv_b=rnd(keys[5], ()),
        Wa=rnd(keys[6], (dim, dim)), ba=rnd(keys[7], (dim,)),
        Wo=rnd(keys[8], (2 * dim, 2 * dim)), bo=rnd(keys[9], (2 * dim,)),
        Wi=rnd(keys[10], (2, 2 * dim)), bi=rnd(keys[11], (2,)),
    )


if __name__ == "__main__":
    dim = 32
    window = 1          # conv kernel size = 3
    layer_gnn = 2
    layer_cnn = 2
    layer_output = 2
    n_fingerprint = 50
    n_word = 60
    n_atoms = 8
    n_words = 16
    batch = 2

    key = jax.random.PRNGKey(0)
    kp, kf, ka, kw = jax.random.split(key, 4)
    params = init_params(kp, n_fingerprint, n_word, dim, window, layer_gnn)

    fingerprints = jax.random.randint(kf, (batch, n_atoms), 0, n_fingerprint,
                                      dtype=jnp.int32)
    words = jax.random.randint(kw, (batch, n_words), 0, n_word, dtype=jnp.int32)
    adjacency = (jax.random.uniform(ka, (batch, n_atoms, n_atoms)) < 0.3
                 ).astype(jnp.float32)
    adjacency = jnp.maximum(adjacency, jnp.transpose(adjacency, (0, 2, 1)))

    out = cpi_forward(params, fingerprints, adjacency, words,
                      layer_gnn=layer_gnn, layer_cnn=layer_cnn,
                      layer_output=layer_output, window=window)
    out = jax.block_until_ready(out)

    ref = cpi_reference(params, fingerprints, adjacency, words,
                        layer_gnn=layer_gnn, layer_cnn=layer_cnn,
                        layer_output=layer_output, window=window)
    ref = jax.block_until_ready(ref)

    assert out.shape == (batch, 2), out.shape
    # bf16 matmul operands (f32 accumulation) -> slightly looser tolerance.
    assert jnp.allclose(out, ref, rtol=5e-2, atol=2e-2), (out, ref)
    print("KERNEL_OK")
</pallas_src>

<mosaic_0001>
module attributes {stable_mosaic.version = 11 : i64} {
  func.func @cpi_kernel(%arg0: i32, %arg1: memref<1xf32, #tpu.memory_space<smem>>, %arg2: memref<1x8x32xf32, #tpu.memory_space<vmem>>, %arg3: memref<1x8x8xf32, #tpu.memory_space<vmem>>, %arg4: memref<1x16x32xf32, #tpu.memory_space<vmem>>, %arg5: memref<32x32xbf16, #tpu.memory_space<vmem>>, %arg6: memref<1x32xf32, #tpu.memory_space<vmem>>, %arg7: memref<32x96xbf16, #tpu.memory_space<vmem>>, %arg8: memref<32x32xbf16, #tpu.memory_space<vmem>>, %arg9: memref<1x32xf32, #tpu.memory_space<vmem>>, %arg10: memref<32x64xbf16, #tpu.memory_space<vmem>>, %arg11: memref<32x64xbf16, #tpu.memory_space<vmem>>, %arg12: memref<64x64xbf16, #tpu.memory_space<vmem>>, %arg13: memref<1x64xf32, #tpu.memory_space<vmem>>, %arg14: memref<64x128xbf16, #tpu.memory_space<vmem>>, %arg15: memref<1x128xf32, #tpu.memory_space<vmem>>, %arg16: memref<1x1x128xf32, #tpu.memory_space<vmem>>, %arg17: memref<24x32xf32, #tpu.memory_space<vmem>>) attributes {dimension_semantics = [#tpu.dimension_semantics<parallel>], iteration_bounds = array<i64: 2>, scalar_prefetch = 0 : i64, scratch_operands = 1 : i64, tpu.core_type = #tpu.core_type<tc>, window_params = [{transform_indices = @transform_0, window_bounds = array<i64: 1>}, {transform_indices = @transform_1, window_bounds = array<i64: 1, 8, 32>}, {transform_indices = @transform_2, window_bounds = array<i64: 1, 8, 8>}, {transform_indices = @transform_3, window_bounds = array<i64: 1, 16, 32>}, {pipeline_mode = #tpu.pipeline_mode<synchronous>, transform_indices = @transform_4, window_bounds = array<i64: 32, 32>}, {pipeline_mode = #tpu.pipeline_mode<synchronous>, transform_indices = @transform_5, window_bounds = array<i64: 1, 32>}, {pipeline_mode = #tpu.pipeline_mode<synchronous>, transform_indices = @transform_6, window_bounds = array<i64: 32, 96>}, {pipeline_mode = #tpu.pipeline_mode<synchronous>, transform_indices = @transform_7, window_bounds = array<i64: 32, 32>}, {pipeline_mode = #tpu.pipeline_mode<synchronous>, transform_indices = @transform_8, window_bounds = array<i64: 1, 32>}, {pipeline_mode = #tpu.pipeline_mode<synchronous>, transform_indices = @transform_9, window_bounds = array<i64: 32, 64>}, {pipeline_mode = #tpu.pipeline_mode<synchronous>, transform_indices = @transform_10, window_bounds = array<i64: 32, 64>}, {pipeline_mode = #tpu.pipeline_mode<synchronous>, transform_indices = @transform_11, window_bounds = array<i64: 64, 64>}, {pipeline_mode = #tpu.pipeline_mode<synchronous>, transform_indices = @transform_12, window_bounds = array<i64: 1, 64>}, {pipeline_mode = #tpu.pipeline_mode<synchronous>, transform_indices = @transform_13, window_bounds = array<i64: 64, 128>}, {pipeline_mode = #tpu.pipeline_mode<synchronous>, transform_indices = @transform_14, window_bounds = array<i64: 1, 128>}, {transform_indices = @transform_15, window_bounds = array<i64: 1, 1, 128>}]} {
    %c0 = arith.constant 0 : index
    %c0_0 = arith.constant 0 : index
    %c0_1 = arith.constant 0 : index
    %0 = vector.load %arg2[%c0, %c0_0, %c0_1] : memref<1x8x32xf32, #tpu.memory_space<vmem>>, vector<1x8x32xf32>
    %1 = vector.shape_cast %0 : vector<1x8x32xf32> to vector<8x32xf32>
    %c0_2 = arith.constant 0 : index
    %c0_3 = arith.constant 0 : index
    %c0_4 = arith.constant 0 : index
    %2 = vector.load %arg3[%c0_2, %c0_3, %c0_4] : memref<1x8x8xf32, #tpu.memory_space<vmem>>, vector<1x8x8xf32>
    %3 = vector.shape_cast %2 : vector<1x8x8xf32> to vector<8x8xf32>
    %4 = arith.truncf %3 : vector<8x8xf32> to vector<8x8xbf16>
    %c0_5 = arith.constant 0 : index
    %c0_6 = arith.constant 0 : index
    %5 = vector.load %arg5[%c0_5, %c0_6] : memref<32x32xbf16, #tpu.memory_space<vmem>>, vector<32x32xbf16>
    %c0_7 = arith.constant 0 : index
    %c0_8 = arith.constant 0 : index
    %6 = vector.load %arg6[%c0_7, %c0_8] : memref<1x32xf32, #tpu.memory_space<vmem>>, vector<1x32xf32>
    %7 = arith.truncf %1 : vector<8x32xf32> to vector<8x32xbf16>
    %cst = arith.constant dense<0.000000e+00> : vector<8x32xf32>
    %8 = tpu.matmul %7, %5, %cst {dimension_numbers = #tpu.dot_dimension_numbers<[1], [0], [0], [1], [0, 0, 1, 1], [], []>} : vector<8x32xbf16>, vector<32x32xbf16>, vector<8x32xf32> -> vector<8x32xf32>
    %9 = vector.broadcast %6 : vector<1x32xf32> to vector<8x32xf32>
    %10 = arith.addf %8, %9 : vector<8x32xf32>
    %cst_9 = arith.constant 0.000000e+00 : f32
    %11 = vector.broadcast %cst_9 : f32 to vector<8x32xf32>
    %12 = arith.maximumf %10, %11 : vector<8x32xf32>
    %13 = arith.truncf %12 : vector<8x32xf32> to vector<8x32xbf16>
    %cst_10 = arith.constant dense<0.000000e+00> : vector<8x32xf32>
    %14 = tpu.matmul %4, %13, %cst_10 {dimension_numbers = #tpu.dot_dimension_numbers<[1], [0], [0], [1], [0, 0, 1, 1], [], []>} : vector<8x8xbf16>, vector<8x32xbf16>, vector<8x32xf32> -> vector<8x32xf32>
    %15 = arith.addf %1, %14 : vector<8x32xf32>
    %16 = arith.truncf %15 : vector<8x32xf32> to vector<8x32xbf16>
    %cst_11 = arith.constant dense<0.000000e+00> : vector<8x32xf32>
    %17 = tpu.matmul %16, %5, %cst_11 {dimension_numbers = #tpu.dot_dimension_numbers<[1], [0], [0], [1], [0, 0, 1, 1], [], []>} : vector<8x32xbf16>, vector<32x32xbf16>, vector<8x32xf32> -> vector<8x32xf32>
    %18 = vector.broadcast %6 : vector<1x32xf32> to vector<8x32xf32>
    %19 = arith.addf %17, %18 : vector<8x32xf32>
    %cst_12 = arith.constant 0.000000e+00 : f32
    %20 = vector.broadcast %cst_12 : f32 to vector<8x32xf32>
    %21 = arith.maximumf %19, %20 : vector<8x32xf32>
    %22 = arith.truncf %21 : vector<8x32xf32> to vector<8x32xbf16>
    %cst_13 = arith.constant dense<0.000000e+00> : vector<8x32xf32>
    %23 = tpu.matmul %4, %22, %cst_13 {dimension_numbers = #tpu.dot_dimension_numbers<[1], [0], [0], [1], [0, 0, 1, 1], [], []>} : vector<8x8xbf16>, vector<8x32xbf16>, vector<8x32xf32> -> vector<8x32xf32>
    %24 = arith.addf %15, %23 : vector<8x32xf32>
    %cst_14 = arith.constant dense<0.000000e+00> : vector<32xf32>
    %25 = vector.multi_reduction <add>, %24, %cst_14 [0] : vector<8x32xf32> to vector<32xf32>
    %26 = vector.shape_cast %25 : vector<32xf32> to vector<1x32xf32>
    %cst_15 = arith.constant 8.000000e+00 : f32
    %27 = vector.broadcast %cst_15 : f32 to vector<1x32xf32>
    %28 = arith.divf %26, %27 : vector<1x32xf32>
    %c0_16 = arith.constant 0 : index
    %c0_17 = arith.constant 0 : index
    %c0_18 = arith.constant 0 : index
    %29 = vector.load %arg4[%c0_16, %c0_17, %c0_18] : memref<1x16x32xf32, #tpu.memory_space<vmem>>, vector<1x16x32xf32>
    %30 = vector.shape_cast %29 : vector<1x16x32xf32> to vector<16x32xf32>
    %c0_19 = arith.constant 0 : index
    %c0_20 = arith.constant 0 : index
    %31 = vector.load %arg7[%c0_19, %c0_20] : memref<32x96xbf16, #tpu.memory_space<vmem>>, vector<32x96xbf16>
    %c0_21 = arith.constant 0 : index
    %32 = memref.load %arg1[%c0_21] : memref<1xf32, #tpu.memory_space<smem>>
    %33 = arith.truncf %30 : vector<16x32xf32> to vector<16x32xbf16>
    %cst_22 = arith.constant dense<0.000000e+00> : vector<16x96xf32>
    %34 = tpu.matmul %33, %31, %cst_22 {dimension_numbers = #tpu.dot_dimension_numbers<[1], [0], [0], [1], [0, 0, 1, 1], [], []>} : vector<16x32xbf16>, vector<32x96xbf16>, vector<16x96xf32> -> vector<16x96xf32>
    %35 = vector.extract_strided_slice %34 {offsets = [0, 0], sizes = [16, 32], strides = [1, 1]} : vector<16x96xf32> to vector<16x32xf32>
    %c1_i32 = arith.constant 1 : i32
    %36 = tpu.dynamic_rotate %35 by %c1_i32 dim 0 : vector<16x32xf32>, i32 -> vector<16x32xf32>
    %37 = tpu.iota {dimensions = array<i32: 0>} : vector<16x32xi32>
    %c1_i32_23 = arith.constant 1 : i32
    %38 = vector.broadcast %c1_i32_23 : i32 to vector<16x32xi32>
    %39 = arith.cmpi sge, %37, %38 : vector<16x32xi32>
    %cst_24 = arith.constant 0.000000e+00 : f32
    %40 = vector.broadcast %cst_24 : f32 to vector<16x32xf32>
    %41 = arith.select %39, %36, %40 : vector<16x32xi1>, vector<16x32xf32>
    %42 = vector.extract_strided_slice %34 {offsets = [0, 32], sizes = [16, 32], strides = [1, 1]} : vector<16x96xf32> to vector<16x32xf32>
    %43 = arith.addf %41, %42 : vector<16x32xf32>
    %44 = vector.extract_strided_slice %34 {offsets = [0, 64], sizes = [16, 32], strides = [1, 1]} : vector<16x96xf32> to vector<16x32xf32>
    %c15_i32 = arith.constant 15 : i32
    %45 = tpu.dynamic_rotate %44 by %c15_i32 dim 0 : vector<16x32xf32>, i32 -> vector<16x32xf32>
    %46 = tpu.iota {dimensions = array<i32: 0>} : vector<16x32xi32>
    %c15_i32_25 = arith.constant 15 : i32
    %47 = vector.broadcast %c15_i32_25 : i32 to vector<16x32xi32>
    %48 = arith.cmpi slt, %46, %47 : vector<16x32xi32>
    %cst_26 = arith.constant 0.000000e+00 : f32
    %49 = vector.broadcast %cst_26 : f32 to vector<16x32xf32>
    %50 = arith.select %48, %45, %49 : vector<16x32xi1>, vector<16x32xf32>
    %51 = arith.addf %43, %50 : vector<16x32xf32>
    %52 = vector.broadcast %32 : f32 to vector<16x32xf32>
    %53 = arith.addf %51, %52 : vector<16x32xf32>
    %cst_27 = arith.constant 0.000000e+00 : f32
    %54 = vector.broadcast %cst_27 : f32 to vector<16x32xf32>
    %55 = arith.maximumf %53, %54 : vector<16x32xf32>
    %56 = arith.truncf %55 : vector<16x32xf32> to vector<16x32xbf16>
    %cst_28 = arith.constant dense<0.000000e+00> : vector<16x96xf32>
    %57 = tpu.matmul %56, %31, %cst_28 {dimension_numbers = #tpu.dot_dimension_numbers<[1], [0], [0], [1], [0, 0, 1, 1], [], []>} : vector<16x32xbf16>, vector<32x96xbf16>, vector<16x96xf32> -> vector<16x96xf32>
    %58 = vector.extract_strided_slice %57 {offsets = [0, 0], sizes = [16, 32], strides = [1, 1]} : vector<16x96xf32> to vector<16x32xf32>
    %c1_i32_29 = arith.constant 1 : i32
    %59 = tpu.dynamic_rotate %58 by %c1_i32_29 dim 0 : vector<16x32xf32>, i32 -> vector<16x32xf32>
    %60 = tpu.iota {dimensions = array<i32: 0>} : vector<16x32xi32>
    %c1_i32_30 = arith.constant 1 : i32
    %61 = vector.broadcast %c1_i32_30 : i32 to vector<16x32xi32>
    %62 = arith.cmpi sge, %60, %61 : vector<16x32xi32>
    %cst_31 = arith.constant 0.000000e+00 : f32
    %63 = vector.broadcast %cst_31 : f32 to vector<16x32xf32>
    %64 = arith.select %62, %59, %63 : vector<16x32xi1>, vector<16x32xf32>
    %65 = vector.extract_strided_slice %57 {offsets = [0, 32], sizes = [16, 32], strides = [1, 1]} : vector<16x96xf32> to vector<16x32xf32>
    %66 = arith.addf %64, %65 : vector<16x32xf32>
    %67 = vector.extract_strided_slice %57 {offsets = [0, 64], sizes = [16, 32], strides = [1, 1]} : vector<16x96xf32> to vector<16x32xf32>
    %c15_i32_32 = arith.constant 15 : i32
    %68 = tpu.dynamic_rotate %67 by %c15_i32_32 dim 0 : vector<16x32xf32>, i32 -> vector<16x32xf32>
    %69 = tpu.iota {dimensions = array<i32: 0>} : vector<16x32xi32>
    %c15_i32_33 = arith.constant 15 : i32
    %70 = vector.broadcast %c15_i32_33 : i32 to vector<16x32xi32>
    %71 = arith.cmpi slt, %69, %70 : vector<16x32xi32>
    %cst_34 = arith.constant 0.000000e+00 : f32
    %72 = vector.broadcast %cst_34 : f32 to vector<16x32xf32>
    %73 = arith.select %71, %68, %72 : vector<16x32xi1>, vector<16x32xf32>
    %74 = arith.addf %66, %73 : vector<16x32xf32>
    %75 = vector.broadcast %32 : f32 to vector<16x32xf32>
    %76 = arith.addf %74, %75 : vector<16x32xf32>
    %cst_35 = arith.constant 0.000000e+00 : f32
    %77 = vector.broadcast %cst_35 : f32 to vector<16x32xf32>
    %78 = arith.maximumf %76, %77 : vector<16x32xf32>
    %79 = vector.shape_cast %28 : vector<1x32xf32> to vector<1x32xf32>
    %80 = vector.broadcast %79 : vector<1x32xf32> to vector<8x32xf32>
    %c0_36 = arith.constant 0 : index
    %c0_37 = arith.constant 0 : index
    %81 = vector.load %arg17[%c0_36, %c0_37] : memref<24x32xf32, #tpu.memory_space<vmem>>, vector<8x32xf32>
    tpu.vector_store %arg17[%c0_36, %c0_37], %80 {strides = array<i32>} : memref<24x32xf32, #tpu.memory_space<vmem>>, vector<8x32xf32>,
    %c8 = arith.constant 8 : index
    %c0_38 = arith.constant 0 : index
    %82 = vector.load %arg17[%c8, %c0_38] : memref<24x32xf32, #tpu.memory_space<vmem>>, vector<16x32xf32>
    tpu.vector_store %arg17[%c8, %c0_38], %78 {strides = array<i32>} : memref<24x32xf32, #tpu.memory_space<vmem>>, vector<16x32xf32>,
    %c0_39 = arith.constant 0 : index
    %c0_40 = arith.constant 0 : index
    %83 = vector.load %arg17[%c0_39, %c0_40] : memref<24x32xf32, #tpu.memory_space<vmem>>, vector<24x32xf32>
    %84 = arith.truncf %83 : vector<24x32xf32> to vector<24x32xbf16>
    %c0_41 = arith.constant 0 : index
    %c0_42 = arith.constant 0 : index
    %85 = vector.load %arg8[%c0_41, %c0_42] : memref<32x32xbf16, #tpu.memory_space<vmem>>, vector<32x32xbf16>
    %cst_43 = arith.constant dense<0.000000e+00> : vector<24x32xf32>
    %86 = tpu.matmul %84, %85, %cst_43 {dimension_numbers = #tpu.dot_dimension_numbers<[1], [0], [0], [1], [0, 0, 1, 1], [], []>} : vector<24x32xbf16>, vector<32x32xbf16>, vector<24x32xf32> -> vector<24x32xf32>
    %c0_44 = arith.constant 0 : index
    %c0_45 = arith.constant 0 : index
    %87 = vector.load %arg9[%c0_44, %c0_45] : memref<1x32xf32, #tpu.memory_space<vmem>>, vector<1x32xf32>
    %88 = vector.broadcast %87 : vector<1x32xf32> to vector<24x32xf32>
    %89 = arith.addf %86, %88 : vector<24x32xf32>
    %cst_46 = arith.constant 0.000000e+00 : f32
    %90 = vector.broadcast %cst_46 : f32 to vector<24x32xf32>
    %91 = arith.maximumf %89, %90 : vector<24x32xf32>
    %92 = vector.extract_strided_slice %91 {offsets = [0, 0], sizes = [1, 32], strides = [1, 1]} : vector<24x32xf32> to vector<1x32xf32>
    %93 = vector.extract_strided_slice %91 {offsets = [8, 0], sizes = [16, 32], strides = [1, 1]} : vector<24x32xf32> to vector<16x32xf32>
    %94 = vector.broadcast %92 : vector<1x32xf32> to vector<16x32xf32>
    %95 = arith.mulf %93, %94 : vector<16x32xf32>
    %cst_47 = arith.constant dense<0.000000e+00> : vector<16xf32>
    %96 = vector.multi_reduction <add>, %95, %cst_47 [1] : vector<16x32xf32> to vector<16xf32>
    %97 = vector.shape_cast %96 : vector<16xf32> to vector<16x1xf32>
    %98 = math.tanh %97 : vector<16x1xf32>
    %99 = vector.broadcast %98 : vector<16x1xf32> to vector<16x32xf32>
    %100 = arith.mulf %99, %93 : vector<16x32xf32>
    %cst_48 = arith.constant dense<0.000000e+00> : vector<32xf32>
    %101 = vector.multi_reduction <add>, %100, %cst_48 [0] : vector<16x32xf32> to vector<32xf32>
    %102 = vector.shape_cast %101 : vector<32xf32> to vector<1x32xf32>
    %cst_49 = arith.constant 1.600000e+01 : f32
    %103 = vector.broadcast %cst_49 : f32 to vector<1x32xf32>
    %104 = arith.divf %102, %103 : vector<1x32xf32>
    %c0_50 = arith.constant 0 : index
    %c0_51 = arith.constant 0 : index
    %105 = vector.load %arg13[%c0_50, %c0_51] : memref<1x64xf32, #tpu.memory_space<vmem>>, vector<1x64xf32>
    %106 = arith.truncf %28 : vector<1x32xf32> to vector<1x32xbf16>
    %c0_52 = arith.constant 0 : index
    %c0_53 = arith.constant 0 : index
    %107 = vector.load %arg10[%c0_52, %c0_53] : memref<32x64xbf16, #tpu.memory_space<vmem>>, vector<32x64xbf16>
    %cst_54 = arith.constant dense<0.000000e+00> : vector<1x64xf32>
    %108 = tpu.matmul %106, %107, %cst_54 {dimension_numbers = #tpu.dot_dimension_numbers<[1], [0], [0], [1], [0, 0, 1, 1], [], []>} : vector<1x32xbf16>, vector<32x64xbf16>, vector<1x64xf32> -> vector<1x64xf32>
    %109 = arith.truncf %104 : vector<1x32xf32> to vector<1x32xbf16>
    %c0_55 = arith.constant 0 : index
    %c0_56 = arith.constant 0 : index
    %110 = vector.load %arg11[%c0_55, %c0_56] : memref<32x64xbf16, #tpu.memory_space<vmem>>, vector<32x64xbf16>
    %cst_57 = arith.constant dense<0.000000e+00> : vector<1x64xf32>
    %111 = tpu.matmul %109, %110, %cst_57 {dimension_numbers = #tpu.dot_dimension_numbers<[1], [0], [0], [1], [0, 0, 1, 1], [], []>} : vector<1x32xbf16>, vector<32x64xbf16>, vector<1x64xf32> -> vector<1x64xf32>
    %112 = arith.addf %108, %111 : vector<1x64xf32>
    %113 = arith.addf %112, %105 : vector<1x64xf32>
    %cst_58 = arith.constant 0.000000e+00 : f32
    %114 = vector.broadcast %cst_58 : f32 to vector<1x64xf32>
    %115 = arith.maximumf %113, %114 : vector<1x64xf32>
    %116 = arith.truncf %115 : vector<1x64xf32> to vector<1x64xbf16>
    %c0_59 = arith.constant 0 : index
    %c0_60 = arith.constant 0 : index
    %117 = vector.load %arg12[%c0_59, %c0_60] : memref<64x64xbf16, #tpu.memory_space<vmem>>, vector<64x64xbf16>
    %cst_61 = arith.constant dense<0.000000e+00> : vector<1x64xf32>
    %118 = tpu.matmul %116, %117, %cst_61 {dimension_numbers = #tpu.dot_dimension_numbers<[1], [0], [0], [1], [0, 0, 1, 1], [], []>} : vector<1x64xbf16>, vector<64x64xbf16>, vector<1x64xf32> -> vector<1x64xf32>
    %119 = arith.addf %118, %105 : vector<1x64xf32>
    %cst_62 = arith.constant 0.000000e+00 : f32
    %120 = vector.broadcast %cst_62 : f32 to vector<1x64xf32>
    %121 = arith.maximumf %119, %120 : vector<1x64xf32>
    %122 = arith.truncf %121 : vector<1x64xf32> to vector<1x64xbf16>
    %c0_63 = arith.constant 0 : index
    %c0_64 = arith.constant 0 : index
    %123 = vector.load %arg14[%c0_63, %c0_64] : memref<64x128xbf16, #tpu.memory_space<vmem>>, vector<64x128xbf16>
    %cst_65 = arith.constant dense<0.000000e+00> : vector<1x128xf32>
    %124 = tpu.matmul %122, %123, %cst_65 {dimension_numbers = #tpu.dot_dimension_numbers<[1], [0], [0], [1], [0, 0, 1, 1], [], []>} : vector<1x64xbf16>, vector<64x128xbf16>, vector<1x128xf32> -> vector<1x128xf32>
    %c0_66 = arith.constant 0 : index
    %c0_67 = arith.constant 0 : index
    %125 = vector.load %arg15[%c0_66, %c0_67] : memref<1x128xf32, #tpu.memory_space<vmem>>, vector<1x128xf32>
    %126 = arith.addf %124, %125 : vector<1x128xf32>
    %c0_68 = arith.constant 0 : index
    %c0_69 = arith.constant 0 : index
    %c0_70 = arith.constant 0 : index
    %127 = vector.load %arg16[%c0_68, %c0_69, %c0_70] : memref<1x1x128xf32, #tpu.memory_space<vmem>>, vector<1x1x128xf32>
    %128 = vector.shape_cast %127 : vector<1x1x128xf32> to vector<1x128xf32>
    %129 = vector.shape_cast %126 : vector<1x128xf32> to vector<1x1x128xf32>
    tpu.vector_store %arg16[%c0_68, %c0_69, %c0_70], %129 {strides = array<i32>} : memref<1x1x128xf32, #tpu.memory_space<vmem>>, vector<1x1x128xf32>,
    return
  }
  func.func @transform_0(%arg0: i32) -> i32 {
    %c0_i32 = arith.constant 0 : i32
    %c0_i32_0 = arith.constant 0 : i32
    return %c0_i32 : i32
  }
  func.func @transform_1(%arg0: i32) -> (i32, i32, i32) {
    %c0_i32 = arith.constant 0 : i32
    %c0_i32_0 = arith.constant 0 : i32
    %c0_i32_1 = arith.constant 0 : i32
    return %arg0, %c0_i32, %c0_i32_0 : i32, i32, i32
  }
  func.func @transform_2(%arg0: i32) -> (i32, i32, i32) {
    %c0_i32 = arith.constant 0 : i32
    %c0_i32_0 = arith.constant 0 : i32
    %c0_i32_1 = arith.constant 0 : i32
    return %arg0, %c0_i32, %c0_i32_0 : i32, i32, i32
  }
  func.func @transform_3(%arg0: i32) -> (i32, i32, i32) {
    %c0_i32 = arith.constant 0 : i32
    %c0_i32_0 = arith.constant 0 : i32
    %c0_i32_1 = arith.constant 0 : i32
    return %arg0, %c0_i32, %c0_i32_0 : i32, i32, i32
  }
  func.func @transform_4(%arg0: i32) -> (i32, i32) {
    %c0_i32 = arith.constant 0 : i32
    %c0_i32_0 = arith.constant 0 : i32
    %c0_i32_1 = arith.constant 0 : i32
    return %c0_i32, %c0_i32_0 : i32, i32
  }
  func.func @transform_5(%arg0: i32) -> (i32, i32) {
    %c0_i32 = arith.constant 0 : i32
    %c0_i32_0 = arith.constant 0 : i32
    %c0_i32_1 = arith.constant 0 : i32
    return %c0_i32, %c0_i32_0 : i32, i32
  }
  func.func @transform_6(%arg0: i32) -> (i32, i32) {
    %c0_i32 = arith.constant 0 : i32
    %c0_i32_0 = arith.constant 0 : i32
    %c0_i32_1 = arith.constant 0 : i32
    return %c0_i32, %c0_i32_0 : i32, i32
  }
  func.func @transform_7(%arg0: i32) -> (i32, i32) {
    %c0_i32 = arith.constant 0 : i32
    %c0_i32_0 = arith.constant 0 : i32
    %c0_i32_1 = arith.constant 0 : i32
    return %c0_i32, %c0_i32_0 : i32, i32
  }
  func.func @transform_8(%arg0: i32) -> (i32, i32) {
    %c0_i32 = arith.constant 0 : i32
    %c0_i32_0 = arith.constant 0 : i32
    %c0_i32_1 = arith.constant 0 : i32
    return %c0_i32, %c0_i32_0 : i32, i32
  }
  func.func @transform_9(%arg0: i32) -> (i32, i32) {
    %c0_i32 = arith.constant 0 : i32
    %c0_i32_0 = arith.constant 0 : i32
    %c0_i32_1 = arith.constant 0 : i32
    return %c0_i32, %c0_i32_0 : i32, i32
  }
  func.func @transform_10(%arg0: i32) -> (i32, i32) {
    %c0_i32 = arith.constant 0 : i32
    %c0_i32_0 = arith.constant 0 : i32
    %c0_i32_1 = arith.constant 0 : i32
    return %c0_i32, %c0_i32_0 : i32, i32
  }
  func.func @transform_11(%arg0: i32) -> (i32, i32) {
    %c0_i32 = arith.constant 0 : i32
    %c0_i32_0 = arith.constant 0 : i32
    %c0_i32_1 = arith.constant 0 : i32
    return %c0_i32, %c0_i32_0 : i32, i32
  }
  func.func @transform_12(%arg0: i32) -> (i32, i32) {
    %c0_i32 = arith.constant 0 : i32
    %c0_i32_0 = arith.constant 0 : i32
    %c0_i32_1 = arith.constant 0 : i32
    return %c0_i32, %c0_i32_0 : i32, i32
  }
  func.func @transform_13(%arg0: i32) -> (i32, i32) {
    %c0_i32 = arith.constant 0 : i32
    %c0_i32_0 = arith.constant 0 : i32
    %c0_i32_1 = arith.constant 0 : i32
    return %c0_i32, %c0_i32_0 : i32, i32
  }
  func.func @transform_14(%arg0: i32) -> (i32, i32) {
    %c0_i32 = arith.constant 0 : i32
    %c0_i32_0 = arith.constant 0 : i32
    %c0_i32_1 = arith.constant 0 : i32
    return %c0_i32, %c0_i32_0 : i32, i32
  }
  func.func @transform_15(%arg0: i32) -> (i32, i32, i32) {
    %c0_i32 = arith.constant 0 : i32
    %c0_i32_0 = arith.constant 0 : i32
    %c0_i32_1 = arith.constant 0 : i32
    return %arg0, %c0_i32, %c0_i32_0 : i32, i32, i32
  }
}

</mosaic_0001>

<bundles_post_ra>
// kernel: tpu_custom_call.1
= control target key start
LH: loop header
LB: loop body
LE: loop exit
PB: predicated region body
PF: predicated region fallthrough
CT: control target
= control target key end

     0   :  { %s3000_s0 = inlined_call_operand.<no memory space> [shape: f32[1], index: 0, kind: input, shape index: {}]   ;;  %s3001_s1 = inlined_call_operand.hbm [shape: f32[2,8,32], index: 1, kind: input, shape index: {}]   ;;  %s3002_s2 = inlined_call_operand.hbm [shape: f32[2,8,8], index: 2, kind: input, shape index: {}]   ;;  %s3003_s3 = inlined_call_operand.hbm [shape: f32[2,16,32], index: 3, kind: input, shape index: {}]   ;;  %s3004_s4 = inlined_call_operand.hbm [shape: bf16[32,32], index: 4, kind: input, shape index: {}]   ;;  %s3005_s5 = inlined_call_operand.vmem [shape: f32[1,32], index: 5, kind: input, shape index: {}]   ;;  %s3006_s6 = inlined_call_operand.hbm [shape: bf16[32,96], index: 6, kind: input, shape index: {}]   ;;  %s3007_s7 = inlined_call_operand.hbm [shape: bf16[32,32], index: 7, kind: input, shape index: {}]   ;;  %s3008_s8 = inlined_call_operand.vmem [shape: f32[1,32], index: 8, kind: input, shape index: {}]   ;;  %s3009_s9 = inlined_call_operand.hbm [shape: bf16[32,64], index: 9, kind: input, shape index: {}]   ;;  %s3010_s10 = inlined_call_operand.hbm [shape: bf16[32,64], index: 10, kind: input, shape index: {}]   ;;  %s3011_s11 = inlined_call_operand.vmem [shape: bf16[64,64], index: 11, kind: input, shape index: {}]   ;;  %s3012_s12 = inlined_call_operand.vmem [shape: f32[1,64], index: 12, kind: input, shape index: {}]   ;;  %s3013_s13 = inlined_call_operand.hbm [shape: bf16[64,128], index: 13, kind: input, shape index: {}]   ;;  %s3014_s14 = inlined_call_operand.vmem [shape: f32[1,128], index: 14, kind: input, shape index: {}]   ;;  %s3015_s15 = inlined_call_operand.hbm [shape: f32[2,1,128], index: 15, kind: output, shape index: {}]  }
   0x1   :  { %3043 = sst [smem:[#allocation32_spill]] %s3002_s2 }
   0x2   :  { %3044 = sst [smem:[#allocation33_spill]] %s3004_s4 }
   0x3   :  { %3045 = sst [smem:[#allocation34_spill]] %s3005_s5 }
   0x4   :  { %3046 = sst [smem:[#allocation35_spill]] %s3007_s7 }
   0x5   :  { %3047 = sst [smem:[#allocation36_spill]] %s3008_s8 }
   0x6   :  { %3048 = sst [smem:[#allocation37_spill]] %s3010_s10 }
   0x7   :  { %3049 = sst [smem:[#allocation38_spill]] %s3011_s11 }
   0x8   :  { %3050 = sst [smem:[#allocation39_spill]] %s3012_s12 }
   0x9   :  { %3051 = sst [smem:[#allocation40_spill]] %s3014_s14 }
   0xa   :  { %3052 = sst [smem:[#allocation41_spill]] %s3015_s15 }
   0xb   :  { %20 = sst [smem:[#allocation3]] %s3000_s0 }
   0xc   :  { %21 = vsyncpa [#allocation5], 0 }
   0xd   :  { %23 = vsyncpa [#allocation5 + $0x1], 0 }
   0xe   :  { %24 = vsyncpa [#allocation8], 0 }
   0xf   :  { %26 = vsyncpa [#allocation8 + $0x1], 0 }
  0x10   :  { %27 = vsyncpa [#allocation11], 0 }
  0x11   :  { %28 = vsyncpa [#allocation14], 0 }
  0x12   :  { %29 = vsyncpa [#allocation17], 0 }
  0x13   :  { %30 = vsyncpa [#allocation6], 0 }
  0x14   :  { %32 = vsyncpa [#allocation6 + $0x1], 0  ;;  %s2433_s20 = smov 0   ;;  %s2435_s21 = smov 0  }
  0x15   :  { %s2437_s22 = smov 0   ;;  %s2439_s23 = smov 0  }
  0x16 LB: > { %3053 = sst [smem:[#allocation26_spill]] %s2318_s20  ;;  %s2332_s0 = smov [#allocation10]   ;;  %s2330_s23 = sphi %s2439_s23, %s3099_s23   ;;  %s2326_s22 = sphi %s2437_s22, %s3101_s22   ;;  %s2322_s21 = sphi %s2435_s21, %s3103_s21   ;;  %s2318_s20 = sphi %s2433_s20, %s3102_s20  }
  0x17   : > { %3054 = sst [smem:[#allocation27_spill]] %s2326_s22  ;;  %s414_s24 = sshll.u32 %s2332_s0, 4  ;;  %s2459_s24 = int_to_ptr.vmem [resolvable:$true] %s414_s24 }
  0x18   : > { %s2454_s25 = sadd.s32 4294967295, %s2330_s23   ;;  %p1654_p0 = scmp.ge.s32.totalorder %s2330_s23, 1 }
  0x19   : > { %p3026_p1 = scmp.eq.s32.totalorder %s2454_s25, 0  ;;  %p399_p2 = scmp.lt.s32.totalorder %s2330_s23, 3 }
  0x1a   : > { %s2333_s27 = smov [#allocation13]   ;;  %s2334_s30 = smov [#allocation16]  }
  0x1b   : > { %p2461_p3 = pnand %p1654_p0, %p399_p2  ;;  %s443_s28 = sshll.u32 %s2333_s27, 4  ;;  %s2474_s28 = int_to_ptr.vmem [resolvable:$true] %s443_s28 }
  0x1c   : > { %s472_s16 = sshll.u32 %s2334_s30, 4  ;;  %s3057_s4 = sld [smem:[#allocation33_spill]]  ;;  %s2476_s16 = int_to_ptr.vmem [resolvable:$true] %s472_s16 }
  0x1d   : > { %s3055_s26 = scalar_select %p2461_p3, 1, 0 }
  0x1e   : > { %p1875_p5 = pneg %p2461_p3 }
  0x20   : > { %p2470_p6 = pnand %p1875_p5, %p3026_p1 }
  0x22   : > { %s3056_s29 = scalar_select %p2470_p6, 1, 0 }
  0x23   : > { %s1990_s19 = scalar_lea.hbm %s3057_s4, 256  ;;  %p2486_p8 = pneg %p2470_p6 }
  0x24   : > { %p1991_p7 = scmp.ne.s32.totalorder %s3057_s4, %s1990_s19  ;;  %p1997_p11 = scmp.lt.u32.totalorder %s1990_s19, %s3057_s4 }
  0x25   : > { %s3058_s27 = scalar_select %p2486_p8, 1, 0 }
  0x26   : > { %p1993_p9 = pnand %p2486_p8, %p1991_p7 }
  0x28   : > { %p1994_p10 = pneg %p1993_p9 }
  0x2a   : > { %p1999_p12 = pnand %p1997_p11, %p1994_p10 }
  0x2c   : > { %2002 = shalt.err (!%p1999_p12)
}
  0x2d   : > { %s2003_s15 = scalar_lea.vmem %s2459_s24, 256  ;;  %p2011_p5 = scmp.lt.s32.totalorder %s2459_s24, %s2459_s24 }
  0x2e   : > { %p2004_p13 = scmp.ne.s32.totalorder %s2459_s24, %s2003_s15  ;;  %p2012_p4 = scmp.lt.s32.totalorder %s2003_s15, %s2003_s15 }
  0x30   : > { %p2006_p0 = pnand %p2004_p13, %p2486_p8  ;;  %p2013_p7 = por %p2012_p4, %p2011_p5 }
  0x32   : > { %p2007_p2 = pneg %p2006_p0 }
  0x34   : > { %p2014_p9 = pnand %p2013_p7, %p2007_p2 }
  0x36   : > { %2017 = shalt.err (!%p2014_p9)
}
  0x37   : > { %s3019_s17 = smov 64   ;;  %s3021_s14 = smov 4  }
  0x38   : > { %1878 = dma.hbm_to_vmem [thread:$0]  (!%p2470_p6), %s3057_s4, 256, %s2459_s24, [#allocation11], %s3019_s17, %s3019_s17, %s3021_s14  }
  0x39   : > { %s3059_s7 = sld [smem:[#allocation35_spill]] }
  0x3f   : > { %s2018_s15 = scalar_lea.hbm %s3059_s7, 256 }
  0x40   : > { %p2019_p4 = scmp.ne.s32.totalorder %s3059_s7, %s2018_s15  ;;  %p2025_p12 = scmp.lt.u32.totalorder %s2018_s15, %s3059_s7 }
  0x42   : > { %p2021_p10 = pnand %p2019_p4, %p2486_p8 }
  0x44   : > { %p2022_p11 = pneg %p2021_p10 }
  0x46   : > { %p2027_p13 = pnand %p2025_p12, %p2022_p11 }
  0x48   : > { %2030 = shalt.err (!%p2027_p13)
}
  0x49   : > { %s2031_s24 = scalar_lea.vmem %s2474_s28, 256  ;;  %p2039_p7 = scmp.lt.s32.totalorder %s2474_s28, %s2474_s28 }
  0x4a   : > { %p2032_p0 = scmp.ne.s32.totalorder %s2474_s28, %s2031_s24  ;;  %p2040_p9 = scmp.lt.s32.totalorder %s2031_s24, %s2031_s24 }
  0x4c   : > { %p2034_p2 = pnand %p2032_p0, %p2486_p8  ;;  %p2041_p4 = por %p2040_p9, %p2039_p7 }
  0x4e   : > { %p2035_p5 = pneg %p2034_p2 }
  0x50   : > { %p2042_p10 = pnand %p2041_p4, %p2035_p5 }
  0x52   : > { %2045 = shalt.err (!%p2042_p10)
}
  0x53   : > { %1884 = dma.hbm_to_vmem [thread:$0]  (!%p2470_p6), %s3059_s7, 256, %s2474_s28, [#allocation14], %s3019_s17, %s3019_s17, %s3021_s14  }
  0x54   : > { %s3060_s10 = sld [smem:[#allocation37_spill]] }
  0x5a   : > { %s2046_s18 = scalar_lea.hbm %s3060_s10, 256 }
  0x5b   : > { %p2047_p11 = scmp.ne.s32.totalorder %s3060_s10, %s2046_s18  ;;  %p2053_p0 = scmp.lt.u32.totalorder %s2046_s18, %s3060_s10 }
  0x5d   : > { %p2049_p12 = pnand %p2047_p11, %p2486_p8 }
  0x5f   : > { %p2050_p13 = pneg %p2049_p12 }
  0x61   : > { %p2055_p2 = pnand %p2053_p0, %p2050_p13 }
  0x63   : > { %2058 = shalt.err (!%p2055_p2)
}
  0x64   : > { %s2059_s28 = scalar_lea.vmem %s2476_s16, 256  ;;  %p2067_p4 = scmp.lt.s32.totalorder %s2476_s16, %s2476_s16 }
  0x65   : > { %p2060_p5 = scmp.ne.s32.totalorder %s2476_s16, %s2059_s28  ;;  %p2068_p10 = scmp.lt.s32.totalorder %s2059_s28, %s2059_s28 }
  0x67   : > { %p2062_p7 = pnand %p2060_p5, %p2486_p8  ;;  %p2069_p11 = por %p2068_p10, %p2067_p4 }
  0x69   : > { %p2063_p9 = pneg %p2062_p7 }
  0x6b   : > { %p2070_p12 = pnand %p2069_p11, %p2063_p9 }
  0x6d   : > { %2073 = shalt.err (!%p2070_p12)
}
  0x6e   : > { %1890 = dma.hbm_to_vmem [thread:$0]  (!%p2470_p6), %s3060_s10, 256, %s2476_s16, [#allocation17], %s3019_s17, %s3019_s17, %s3021_s14  }
  0x6f   : > { %s1653_s8 = sadd.s32 4294967294, %s2330_s23   ;;  %s2564_s11 = sadd.s32 1, %s2330_s23  }
  0x70   : > { %3061 = sst [smem:[#allocation28_spill]] %s2564_s11  ;;  %s66_s12 = sadd.s32 1, %s2326_s22 }
  0x71   : > { %s63_s18 = ssub.s32 %s2330_s23, %s2564_s11  ;;  %p73_p13 = scmp.ne.s32.totalorder %s2326_s22, %s2322_s21 }
  0x72   : > { %p64_p0 = scmp.eq.s32.totalorder %s63_s18, 0  ;;  %p74_p2 = scmp.eq.s32.totalorder %s2330_s23, 0 }
  0x73   : > { %p79_p5 = scmp.ne.s32.totalorder %s2322_s21, %s2318_s20  ;;  %p386_p7 = scmp.eq.s32.totalorder %s2454_s25, 1 }
  0x74   : > { %s2576_s19 = scalar_select %p64_p0, %s2326_s22, %s66_s12  }
  0x75   : > { %p75_p9 = por %p74_p2, %p73_p13  ;;  %p2580_p4 = por %p3026_p1, %p79_p5 }
  0x76   : > { %3062 = sst [smem:[#allocation29_spill]] %s2576_s19  ;;  %p2584_p10 = por %p386_p7, %p73_p13 }
  0x77   : > { %s3063_s16 = scalar_select %p2580_p4, 1, 0 }
  0x78   : > { %s3064_s0 = scalar_select %p2584_p10, 1, 0 }
  0x79   : > { %p392_p11 = scmp.eq.s32.totalorder %s1653_s8, 1  ;;  %p1914_p12 = scmp.lt.s32.totalorder %s2330_s23, 2 }
  0x7a   : > { %3065 = sst [smem:[#allocation30_spill]] %s3064_s0  ;;  %s2590_s30 = sand.u32 1, %s2326_s22  }
  0x7b   : > { %p2592_p3 = por %p392_p11, %p79_p5  ;;  %s3024_s28 = sshll.u32 %s2590_s30, 3 }
  0x7c   : > { %s3025_s24 = sshll.u32 %s2330_s23, 7  ;;  %p2598_p0 = pnand %p1914_p12, %p75_p9 }
  0x7d   : > { %s3066_s15 = scalar_select %p2592_p3, 1, 0 }
  0x7e   : > { %s3068_s5 = scalar_select %p2598_p0, 1, 0 }
  0x7f   : > { %3067 = sst [smem:[#allocation31_spill]] %s3066_s15  ;;  %s526_s12 = sand.u32 1, %s2330_s23  }
  0x80   : > { %s3069_s2 = sld [smem:[#allocation32_spill]]  ;;  %s530_s14 = scalar_lea.vmem [#allocation7], %s3024_s28 }
  0x81   : > { %s537_s4 = sshll.u32 %s530_s14, 4  ;;  %s1666_s7 = sshll.u32 %s2590_s30, 4  ;;  %s2612_s4 = int_to_ptr.vmem [resolvable:$true] %s537_s4 }
  0x82   : > { %s2615_s10 = scalar_lea.sflag [#allocation8], %s526_s12  ;;  %p2621_p2 = pneg %p2598_p0 }
  0x84   : > { %s3070_s22 = scalar_select %p2621_p2, 1, 0 }
  0x86   : > { %s2608_s17 = scalar_lea.hbm %s3069_s2, %s3025_s24  ;;  %s2079_s14 = scalar_lea.hbm %s3069_s2, 256 }
  0x87   : > { %s2074_s19 = scalar_lea.hbm %s2608_s17, 128  ;;  %p2080_p9 = scmp.lt.u32.totalorder %s2608_s17, %s3069_s2 }
  0x88   : > { %p2075_p13 = scmp.ne.s32.totalorder %s2608_s17, %s2074_s19  ;;  %p2081_p11 = scmp.lt.u32.totalorder %s2079_s14, %s2074_s19 }
  0x89   : > { %p2083_p1 = scmp.lt.u32.totalorder %s2074_s19, %s2608_s17 }
  0x8a   : > { %p2077_p5 = pnand %p2621_p2, %p2075_p13  ;;  %p2082_p12 = por %p2081_p11, %p2080_p9 }
  0x8c   : > { %p2078_p7 = pneg %p2077_p5  ;;  %p2084_p3 = por %p2083_p1, %p2082_p12 }
  0x8e   : > { %p2085_p10 = pnand %p2084_p3, %p2078_p7 }
  0x90   : > { %2088 = shalt.err (!%p2085_p10)
}
  0x91   : > { %s2089_s12 = scalar_lea.vmem %s2612_s4, 128  ;;  %s2337_s8 = smov [#allocation7]  }
  0x92   : > { %p2090_p13 = scmp.ne.s32.totalorder %s2612_s4, %s2089_s12  ;;  %s2094_s18 = sshll.u32 %s2337_s8, 4  ;;  %s2095_s18 = int_to_ptr.vmem [resolvable:$false] %s2094_s18 }
  0x93   : > { %s2096_s28 = scalar_lea.vmem %s2095_s18, 256  ;;  %p2097_p6 = scmp.lt.s32.totalorder %s2612_s4, %s2095_s18 }
  0x94   : > { %p2092_p5 = pnand %p2090_p13, %p2621_p2  ;;  %p2098_p8 = scmp.lt.s32.totalorder %s2096_s28, %s2089_s12 }
  0x96   : > { %p2093_p4 = pneg %p2092_p5  ;;  %p2099_p9 = por %p2098_p8, %p2097_p6 }
  0x98   : > { %p2100_p11 = pnand %p2099_p9, %p2093_p4 }
  0x9a   : > { %2103 = shalt.err (!%p2100_p11)
}
  0x9b   : > { %1900 = dma.hbm_to_vmem [thread:$0]  (!%p2598_p0), %s2608_s17, 128, %s2612_s4, %s2615_s10  }
  0x9c   : > { %s548_s19 = scalar_lea.vmem [#allocation9], %s1666_s7  ;;  %s2338_s14 = smov [#allocation12]  }
  0x9d   : > { %s555_s24 = sshll.u32 %s548_s19, 4  ;;  %s430_s8 = sshll.u32 %s2338_s14, 4  ;;  %s2647_s24 = int_to_ptr.vmem [resolvable:$true] %s555_s24  ;;  %s431_s8 = int_to_ptr.vmem [resolvable:$true] %s430_s8 }
  0x9e   : > { %s2104_s28 = scalar_lea.hbm %s3006_s6, 256  ;;  %p3071_p3 = scmp.ne.s32.totalorder %s3058_s27, 0 }
  0x9f   : > { %p2105_p1 = scmp.ne.s32.totalorder %s3006_s6, %s2104_s28  ;;  %p2111_p4 = scmp.lt.u32.totalorder %s2104_s28, %s3006_s6 }
  0xa1   : > { %p2107_p6 = pnand %p2105_p1, %p3071_p3 }
  0xa3   : > { %p2108_p8 = pneg %p2107_p6 }
  0xa5   : > { %p2113_p10 = pnand %p2111_p4, %p2108_p8 }
  0xa7   : > { %2116 = shalt.err (!%p2113_p10)
}
  0xa8   : > { %s2117_s7 = scalar_lea.vmem %s431_s8, 256  ;;  %p2125_p5 = scmp.lt.s32.totalorder %s431_s8, %s431_s8 }
  0xa9   : > { %p2118_p7 = scmp.ne.s32.totalorder %s431_s8, %s2117_s7  ;;  %p2126_p9 = scmp.lt.s32.totalorder %s2117_s7, %s2117_s7 }
  0xab   : > { %p2120_p12 = pnand %p2118_p7, %p3071_p3  ;;  %p2127_p11 = por %p2126_p9, %p2125_p5 }
  0xad   : > { %p2121_p13 = pneg %p2120_p12 }
  0xaf   : > { %p2128_p0 = pnand %p2127_p11, %p2121_p13 }
  0xb1   : > { %2131 = shalt.err (!%p2128_p0)
}
  0xb2   : > { %p3072_p1 = scmp.ne.s32.totalorder %s3056_s29, 0  ;;  %s3073_s2 = smov 4  }
  0xb3   : > { %s3074_s11 = smov 64   ;;  %s2339_s12 = smov [#allocation15]  }
  0xb4   : > { %1881 = dma.hbm_to_vmem [thread:$0]  (!%p3072_p1), %s3006_s6, 256, %s431_s8, [#allocation11], %s3074_s11, %s3074_s11, %s3073_s2  }
  0xb5   : > { %s459_s18 = sshll.u32 %s2339_s12, 4  ;;  %s2340_s28 = smov [#allocation18]   ;;  %s460_s18 = int_to_ptr.vmem [resolvable:$true] %s459_s18 }
  0xb6   : > { %s491_s4 = sshll.u32 %s2340_s28, 4  ;;  %s2132_s15 = scalar_lea.hbm %s3009_s9, 256  ;;  %s2670_s4 = int_to_ptr.vmem [resolvable:$true] %s491_s4 }
  0xb7   : > { %p2133_p0 = scmp.ne.s32.totalorder %s3009_s9, %s2132_s15  ;;  %p2139_p4 = scmp.lt.u32.totalorder %s2132_s15, %s3009_s9 }
  0xb9   : > { %p2135_p6 = pnand %p2133_p0, %p3071_p3 }
  0xbb   : > { %p2136_p8 = pneg %p2135_p6 }
  0xbd   : > { %p2141_p10 = pnand %p2139_p4, %p2136_p8 }
  0xbf   : > { %2144 = shalt.err (!%p2141_p10)
}
  0xc0   : > { %s2145_s14 = scalar_lea.vmem %s460_s18, 256  ;;  %p2153_p5 = scmp.lt.s32.totalorder %s460_s18, %s460_s18 }
  0xc1   : > { %p2146_p7 = scmp.ne.s32.totalorder %s460_s18, %s2145_s14  ;;  %p2154_p9 = scmp.lt.s32.totalorder %s2145_s14, %s2145_s14 }
  0xc3   : > { %p2148_p12 = pnand %p2146_p7, %p3071_p3  ;;  %p2155_p11 = por %p2154_p9, %p2153_p5 }
  0xc5   : > { %p2149_p13 = pneg %p2148_p12 }
  0xc7   : > { %p2156_p2 = pnand %p2155_p11, %p2149_p13 }
  0xc9   : > { %2159 = shalt.err (!%p2156_p2)
}
  0xca   : > { %1887 = dma.hbm_to_vmem [thread:$0]  (!%p3072_p1), %s3009_s9, 256, %s460_s18, [#allocation14], %s3074_s11, %s3074_s11, %s3073_s2  }
  0xcb   : > { %s2160_s28 = scalar_lea.hbm %s3013_s13, 512 }
  0xcc   : > { %p2161_p0 = scmp.ne.s32.totalorder %s3013_s13, %s2160_s28  ;;  %p2167_p8 = scmp.lt.u32.totalorder %s2160_s28, %s3013_s13 }
  0xce   : > { %p2163_p2 = pnand %p2161_p0, %p3071_p3 }
  0xd0   : > { %p2164_p6 = pneg %p2163_p2 }
  0xd2   : > { %p2169_p4 = pnand %p2167_p8, %p2164_p6 }
  0xd4   : > { %2172 = shalt.err (!%p2169_p4)
}
  0xd5   : > { %s2173_s18 = scalar_lea.vmem %s2670_s4, 512  ;;  %p2181_p13 = scmp.lt.s32.totalorder %s2670_s4, %s2670_s4 }
  0xd6   : > { %p2174_p10 = scmp.ne.s32.totalorder %s2670_s4, %s2173_s18  ;;  %p2182_p5 = scmp.lt.s32.totalorder %s2173_s18, %s2173_s18 }
  0xd8   : > { %p2176_p7 = pnand %p2174_p10, %p3071_p3  ;;  %p2183_p9 = por %p2182_p5, %p2181_p13 }
  0xda   : > { %p2177_p12 = pneg %p2176_p7 }
  0xdc   : > { %p2184_p11 = pnand %p2183_p9, %p2177_p12 }
  0xde   : > { %2187 = shalt.err (!%p2184_p11)
}
  0xdf   : > { %1893 = dma.hbm_to_vmem [thread:$0]  (!%p3072_p1), %s3013_s13, 512, %s2670_s4, [#allocation17], %s3074_s11, %s3074_s11, %s3073_s2  }
  0xe0   : > { %s3075_s27 = sshll.u32 %s2330_s23, 7  ;;  %s3076_s29 = sshll.u32 %s2590_s30, 3 }
  0xe1   : > { %s2724_s12 = scalar_lea.hbm %s3001_s1, %s3075_s27  ;;  %s512_s28 = scalar_lea.vmem [#allocation4], %s3076_s29 }
  0xe2   : > { %s519_s17 = sshll.u32 %s512_s28, 4  ;;  %s1714_s7 = sshll.u32 %s2330_s23, 8  ;;  %s2728_s17 = int_to_ptr.vmem [resolvable:$true] %s519_s17 }
  0xe3   : > { %s509_s19 = scalar_lea.sflag [#allocation5], %s2590_s30  ;;  %s2188_s8 = scalar_lea.hbm %s2724_s12, 128 }
  0xe4   : > { %p2189_p3 = scmp.ne.s32.totalorder %s2724_s12, %s2188_s8  ;;  %p3077_p1 = scmp.ne.s32.totalorder %s3070_s22, 0 }
  0xe5   : > { %s2193_s4 = scalar_lea.hbm %s3001_s1, 256  ;;  %p2194_p6 = scmp.lt.u32.totalorder %s2724_s12, %s3001_s1 }
  0xe6   : > { %p2191_p0 = pnand %p2189_p3, %p3077_p1  ;;  %p2195_p8 = scmp.lt.u32.totalorder %s2193_s4, %s2188_s8 }
  0xe7   : > { %p2197_p10 = scmp.lt.u32.totalorder %s2188_s8, %s2724_s12 }
  0xe8   : > { %p2192_p2 = pneg %p2191_p0  ;;  %p2196_p4 = por %p2195_p8, %p2194_p6 }
  0xea   : > { %p2198_p7 = por %p2197_p10, %p2196_p4 }
  0xec   : > { %p2199_p12 = pnand %p2198_p7, %p2192_p2 }
  0xee   : > { %2202 = shalt.err (!%p2199_p12)
}
  0xef   : > { %s2203_s30 = scalar_lea.vmem %s2728_s17, 128  ;;  %s2341_s20 = smov [#allocation4]  }
  0xf0   : > { %p2204_p13 = scmp.ne.s32.totalorder %s2728_s17, %s2203_s30  ;;  %s2208_s27 = sshll.u32 %s2341_s20, 4  ;;  %s2209_s27 = int_to_ptr.vmem [resolvable:$false] %s2208_s27 }
  0xf1   : > { %s2210_s0 = scalar_lea.vmem %s2209_s27, 256  ;;  %p2211_p11 = scmp.lt.s32.totalorder %s2728_s17, %s2209_s27 }
  0xf2   : > { %p2206_p5 = pnand %p2204_p13, %p3077_p1  ;;  %p2212_p3 = scmp.lt.s32.totalorder %s2210_s0, %s2203_s30 }
  0xf4   : > { %p2207_p9 = pneg %p2206_p5  ;;  %p2213_p0 = por %p2212_p3, %p2211_p11 }
  0xf6   : > { %p2214_p6 = pnand %p2213_p0, %p2207_p9 }
  0xf8   : > { %2217 = shalt.err (!%p2214_p6)
}
  0xf9   : > { %p3078_p2 = scmp.ne.s32.totalorder %s3068_s5, 0  ;;  %s2758_s28 = scalar_lea.hbm %s3003_s3, %s1714_s7 }
  0xfa   : > { %s2218_s8 = scalar_lea.hbm %s2758_s28, 256  ;;  %s2223_s4 = scalar_lea.hbm %s3003_s3, 512 }
  0xfb   : > { %1897 = dma.hbm_to_vmem [thread:$0]  (!%p3078_p2), %s2724_s12, 128, %s2728_s17, %s509_s19  }
  0xfc   : > { %p2219_p8 = scmp.ne.s32.totalorder %s2758_s28, %s2218_s8  ;;  %p2224_p7 = scmp.lt.u32.totalorder %s2758_s28, %s3003_s3 }
  0xfd   : > { %p2225_p12 = scmp.lt.u32.totalorder %s2223_s4, %s2218_s8  ;;  %p2227_p5 = scmp.lt.u32.totalorder %s2218_s8, %s2758_s28 }
  0xfe   : > { %p2221_p4 = pnand %p2219_p8, %p3077_p1 }
  0xff   : > { %p2226_p13 = por %p2225_p12, %p2224_p7 }
 0x100   : > { %p2222_p10 = pneg %p2221_p4 }
 0x101   : > { %p2228_p9 = por %p2227_p5, %p2226_p13 }
 0x103   : > { %p2229_p11 = pnand %p2228_p9, %p2222_p10 }
 0x105   : > { %2232 = shalt.err (!%p2229_p11)
}
 0x106   : > { %s2233_s7 = scalar_lea.vmem %s2647_s24, 256  ;;  %s2342_s19 = smov [#allocation9]  }
 0x107   : > { %p2234_p3 = scmp.ne.s32.totalorder %s2647_s24, %s2233_s7  ;;  %s2238_s18 = sshll.u32 %s2342_s19, 4  ;;  %s2239_s18 = int_to_ptr.vmem [resolvable:$false] %s2238_s18 }
 0x108   : > { %s2240_s14 = scalar_lea.vmem %s2239_s18, 512  ;;  %p2241_p8 = scmp.lt.s32.totalorder %s2647_s24, %s2239_s18 }
 0x109   : > { %p2236_p0 = pnand %p2234_p3, %p3077_p1  ;;  %p2242_p4 = scmp.lt.s32.totalorder %s2240_s14, %s2233_s7 }
 0x10b   : > { %p2237_p6 = pneg %p2236_p0  ;;  %p2243_p7 = por %p2242_p4, %p2241_p8 }
 0x10d   : > { %p2244_p12 = pnand %p2243_p7, %p2237_p6 }
 0x10f   : > { %2247 = shalt.err (!%p2244_p12)
}
 0x110   : > { %s2343_s30 = smov 128   ;;  %s2344_s20 = smov 8  }
 0x111   : > { %1903 = dma.hbm_to_vmem [thread:$0]  (!%p3078_p2), %s2758_s28, 256, %s2647_s24, %s2615_s10, %s2343_s30, %s2343_s30, %s2344_s20  }
 0x112   : > { %p3079_p1 = scmp.ne.s32.totalorder %s3055_s26, 0 }
 0x113   : > { %s2785_s22 = sand.u32 (!%p3079_p1), 1, %s2322_s21   ;;  %p3080_p10 = scmp.ne.s32.totalorder (!%p3079_p1), %s3063_s16, 0 }
 0x114   : > { %567 = sbr.rel (%p3079_p1) target bundleno = 2509 (0x9cd), region = 80  ;;  %s1670_s27 = sshll.u32 (!%p3079_p1), %s2785_s22, 3 }
 0x115   : > { %s570_s0 = scalar_lea.sflag (!%p3079_p1), [#allocation5], %s2785_s22  ;;  %s573_s15 = scalar_lea.vmem (!%p3079_p1), [#allocation4], %s1670_s27 }
 0x11b   : > { %2293 = dma.done.wait (%p3080_p10), %s570_s0, 128  }
 0x11c   : > { %2295 = vsyncadd (%p3080_p10), %s570_s0, 4294967168  ;;  %s578_s10 = sand.u32 1, %s2454_s25   ;;  %s2794_s26 = scalar_lea.vmem [#allocation7], %s1670_s27 }
 0x11d   : > { %s579_s5 = scalar_lea.sflag [#allocation8], %s578_s10 }
 0x11e   : > { %2297 = dma.done.wait (%p3080_p10), %s579_s5, 384  }
 0x11f   : > { %2299 = vsyncadd (%p3080_p10), %s579_s5, 4294966912  ;;  %s1672_s24 = sshll.u32 %s2785_s22, 4  ;;  %p3081_p2 = scmp.eq.s32.totalorder %s2454_s25, 0 }
 0x120   : > { %s2801_s29 = scalar_lea.vmem [#allocation9], %s1672_s24 }
 0x121   : > { %2301 = dma.done.wait (%p3081_p2), [#allocation11], 512   ;;  %p3082_p13 = pmov %p3081_p2 }
 0x122   : > { %p3083_p5 = pmov %p3081_p2 }
 0x123   : > { %2303 = vsyncadd (%p3082_p13), [#allocation11], 4294966784 }
 0x124   : > { %2305 = dma.done.wait (%p3083_p5), [#allocation14], 512   ;;  %p3084_p9 = pmov %p3081_p2 }
 0x125   : > { %p3085_p11 = pmov %p3081_p2 }
 0x126   : > { %2307 = vsyncadd (%p3084_p9), [#allocation14], 4294966784 }
 0x127   : > { %2309 = dma.done.wait (%p3085_p11), [#allocation17], 768   ;;  %p3086_p3 = pmov %p3081_p2 }
 0x128   : > { %v2345_v0 = vmov 0.0   ;;  %vm2346_vm0 = vmmov 0   ;;  %v1968_v1 = vld [vmem:[#allocation10] sm:$0xff]   ;;  %v1969_v2 = vld [vmem:[#allocation10 + $0x8] sm:$0xff]   ;;  %vm699_vm1 = vcmask 261120   ;;  %s3087_s8 = sld [smem:[#allocation34_spill]]  ;;  %v959_v31 = vlaneseq }
 0x129   : > { %2311 = vsyncadd (%p3086_p3), [#allocation17], 4294966528  ;;  %1751 = vmatprep.subr.bf16.mxu0 %v2345_v0  ;;  %1755 = vmatprep.mubr.msk.bf16.mxu0 %vm2346_vm0, %v2345_v0  ;;  %v672_v3 = vld [vmem:[%s573_s15] sm:$0xff]  ;;  %vm749_vm2 = vcmask 1043456   ;;  %v673_v12 = vld [vmem:[%s2794_s26] sm:$0xff]  ;;  %vm745_vm3 = vcmask 64512  }
 0x12a   : > { %1759 = vmatprep.subr.bf16.mxu1 %v2345_v0  ;;  %1761 = vmatprep.mubr.msk.bf16.mxu1 %vm2346_vm0, %v2345_v0  ;;  %v680_v4 = vpack.c.bf16 %v672_v3, %v672_v3  ;;  %v674_v15 = vpack.c.bf16 %v673_v12, %v673_v12  ;;  %v1970_v20 = vld [vmem:[#allocation12] sm:$0xff]   ;;  %v1971_v23 = vld [vmem:[#allocation12 + $0x8] sm:$0xff]   ;;  %v2848_v35 = vshrl.u32 %v959_v31, 7  ;;  %s2347_s2 = smov 96   ;;  %s2348_s11 = smov 64   ;;  %vm1351_vm8 = vcmask 523264  }
 0x12b   : > { %1752 = vmatpush3.bf16.msra.mxu0 %v1968_v1  ;;  %v893_v24 = vld [vmem:[%s2801_s29] sm:$0xff]  ;;  %v894_v25 = vld [vmem:[%s2801_s29 + $0x8] sm:$0xff]  ;;  %s899_s4 = sld [smem:[#allocation3]]  ;;  %s3088_s7 = sld [smem:[#allocation36_spill]] }
 0x12c   : > { %1753 = vmatprep.subr.bf16.mxu0 %v2345_v0  ;;  %v900_v26 = vpack.c.bf16 %v894_v25, %v893_v24  ;;  %vm961_vm4 = vcmp.lt.s32.totalorder %v2848_v35, 1  ;;  %v2867_v47 = vadd.s32 8, %v2848_v35  ;;  %vm965_vm5 = vcmp.ge.s32.totalorder %v2848_v35, 1  ;;  %s3089_s14 = sld [smem:[#allocation38_spill]]  ;;  %s3090_s24 = sld [smem:[#allocation39_spill]] }
 0x12d   : > { %vm987_vm6 = vcmp.lt.s32.totalorder %v2848_v35, 7  ;;  %s3091_s28 = sld [smem:[#allocation40_spill]]  ;;  %s1475_s18 = scalar_lea.sflag [#allocation6], %s2785_s22 }
 0x12e   : > { %v1679_v5 = vld [vmem:[%s3087_s8] ss:$0 sm:$0xff]  ;;  %vm991_vm7 = vcmp.lt.s32.totalorder %v2867_v47, 15  ;;  %v1975_v47 = vld [vmem:[#allocation15 + $0x8] sm:$0xff]   ;;  %s3092_s8 = sld [smem:[#allocation30_spill]]  ;;  %s2349_s30 = smov [#allocation19]  }
 0x12f   : > { %1754 = vmatpush3.bf16.msra.mxu0 %v1969_v2  ;;  %s2252_s20 = sshll.u32 %s2349_s30, 4  ;;  %s2253_s20 = int_to_ptr.vmem [resolvable:$false] %s2252_s20 }
 0x130   : > { %1773 = vmatprep.subr.bf16.mxu0 %v2345_v0  ;;  %s2254_s27 = scalar_lea.vmem %s2253_s20, 32 }
 0x131   : > { %v996_v55 = vstv %s899_s4 }
 0x132   : > { %1756 = vmatmul.mubr.msk.bf16.vlgmr.msra.gmra.mrb[0].mxu0 %vm699_vm1, %v680_v4 }
 0x133   : > { %1775 = vmatprep.mubr.msk.bf16.mxu0 %vm2346_vm0, %v2345_v0 }
 0x134   : > { %p3094_p6 = scmp.ne.s32.totalorder %s3092_s8, 0 }
 0x205   : > { %v737_v6 = vpop.f32.mrb[0].mxu0 }
 0x206   : > { %v738_v7 = vadd.f32 %v1679_v5, %v737_v6  ;;  %v1757_v8 = vpop.f32.mrb[1].mxu0 }
 0x207   : > { %v740_v9 = vpop.f32.mrb[2].mxu0 }
 0x208   : > { %v743_v10 = vmax.f32 %v738_v7, 0.0  ;;  %v1758_v11 = vpop.f32.mrb[3].mxu0 }
 0x20a   : > { %v744_v13 = vpack.c.bf16 %v743_v10, %v743_v10 }
 0x20c   : > { %v751_v14 = vsel %vm749_vm2, %v744_v13, 0 }
 0x20d   : > { %1760 = vmatpush3.bf16.msra.mxu1 %v751_v14 }
 0x20e   : > { %1765 = vmatprep.subr.bf16.mxu1 %v2345_v0 }
 0x210   : > { %1762 = vmatmul.mubr.msk.bf16.vlgmr.msra.gmra.mrb[0].mxu1 %vm745_vm3, %v674_v15 }
 0x211   : > { %1766 = vmatpush3.bf16.msra.mxu1 %v1968_v1  ;;  %1769 = vmatprep.mubr.msk.bf16.mxu1 %vm2346_vm0, %v2345_v0 }
 0x212   : > { %1767 = vmatprep.subr.bf16.mxu1 %v2345_v0 }
 0x215   : > { %1768 = vmatpush3.bf16.msra.mxu1 %v1969_v2 }
 0x216   : > { %1779 = vmatprep.subr.bf16.mxu1 %v2345_v0 }
 0x2e3   : > { %v787_v16 = vpop.f32.mrb[0].mxu1 }
 0x2e4   : > { %v2837_v17 = vadd.f32 %v787_v16, %v672_v3  ;;  %v1763_v18 = vpop.f32.mrb[1].mxu1 }
 0x2e5   : > { %v790_v19 = vpop.f32.mrb[2].mxu1 }
 0x2e6   : > { %v794_v21 = vpack.c.bf16 %v2837_v17, %v2837_v17  ;;  %v1764_v22 = vpop.f32.mrb[3].mxu1 }
 0x2e8   : > { %1770 = vmatmul.mubr.msk.bf16.vlgmr.msra.gmra.mrb[4].mxu1 %vm699_vm1, %v794_v21 }
 0x2e9   : > { %1780 = vmatpush3.bf16.msra.mxu1 %v1970_v20  ;;  %1783 = vmatprep.mubr.msk.bf16.mxu1 %vm2346_vm0, %v2345_v0 }
 0x2ea   : > { %1781 = vmatprep.subr.bf16.mxu1 %v2345_v0 }
 0x2ed   : > { %1782 = vmatpush3.bf16.msra.mxu1 %v1971_v23 }
 0x2f0   : > { %1784 = vmatmul.mubr.msk.bf16.vlgmr.msra.gmra.mrb[8].mxu1 %vm699_vm1, %v900_v26 }
 0x3bb   : > { %v832_v27 = vpop.f32.mrb[4].mxu1 }
 0x3bc   : > { %v833_v28 = vadd.f32 %v1679_v5, %v832_v27  ;;  %v1771_v29 = vpop.f32.mrb[5].mxu1 }
 0x3bd   : > { %v835_v30 = vpop.f32.mrb[6].mxu1 }
 0x3be   : > { %v838_v32 = vmax.f32 %v833_v28, 0.0  ;;  %v1772_v33 = vpop.f32.mrb[7].mxu1 }
 0x3c0   : > { %v839_v34 = vpack.c.bf16 %v838_v32, %v838_v32 }
 0x3c2   : > { %v841_v36 = vsel %vm749_vm2, %v839_v34, 0 }
 0x3c3   : > { %1774 = vmatpush3.bf16.msra.mxu0 %v841_v36  ;;  %v950_v37 = vpop.f32.mrb[8].mxu1 }
 0x3c4   : > { %971 = vrot.lane.b32.xlu1 %v950_v37, %s2347_s2  ;;  %979 = vrot.lane.b32.xlu0 %v950_v37, %s2348_s11  ;;  %v1785_v38 = vpop.f32.mrb[9].mxu1  ;;  %v957_v40 = vrot.slane %v950_v37, 7 }
 0x3c5   : > { %v953_v39 = vpop.f32.mrb[10].mxu1  ;;  %1787 = vmatprep.subr.bf16.mxu0 %v2345_v0 }
 0x3c6   : > { %v958_v41 = vrot.slane %v953_v39, 7  ;;  %1776 = vmatmul.mubr.msk.bf16.vlgmr.msra.gmra.mrb[4].mxu0 %vm745_vm3, %v674_v15  ;;  %v1786_v42 = vpop.f32.mrb[11].mxu1 }
 0x3c7   : > { %1788 = vmatpush3.bf16.msra.mxu0 %v1970_v20  ;;  %1791 = vmatprep.mubr.msk.bf16.mxu0 %vm2346_vm0, %v2345_v0  ;;  %v1973_v20 = vld [vmem:[#allocation13 + $0x8] sm:$0xff]  }
 0x3c8   : > { %973 = vrot.lane.b32.xlu1 %v953_v39, %s2347_s2  ;;  %981 = vrot.lane.b32.xlu0 %v953_v39, %s2348_s11  ;;  %v963_v43 = vsel %vm961_vm4, %v958_v41, %v957_v40  ;;  %v962_v44 = vsel %vm961_vm4, %v957_v40, %v958_v41 }
 0x3c9   : > { %1789 = vmatprep.subr.bf16.mxu0 %v2345_v0  ;;  %v967_v50 = vsel %vm965_vm5, %v963_v43, 0.0 }
 0x3cb   : > { %1790 = vmatpush3.bf16.msra.mxu0 %v1971_v23 }
 0x3cc   : > { %1803 = vmatprep.subr.bf16.mxu0 %v2345_v0 }
 0x436   : > { %v972_v45 = vpop.permute.xlu1 %971  ;;  %v980_v46 = vpop.permute.xlu0 %979 }
 0x437   : > { %v985_v51 = vrot.slane %v980_v46, 1  ;;  %v977_v53 = vadd.f32 %v972_v45, %v967_v50  ;;  %v1974_v50 = vld [vmem:[#allocation15] sm:$0xff]  }
 0x43a   : > { %v974_v48 = vpop.permute.xlu1 %973  ;;  %v982_v49 = vpop.permute.xlu0 %981 }
 0x43b   : > { %v986_v52 = vrot.slane %v982_v49, 1  ;;  %v978_v54 = vadd.f32 %v974_v48, %v962_v44 }
 0x43d   : > { %v988_v56 = vsel %vm987_vm6, %v985_v51, %v986_v52  ;;  %v989_v57 = vsel %vm987_vm6, %v986_v52, %v985_v51 }
 0x43e   : > { %v993_v58 = vsel %vm991_vm7, %v989_v57, 0.0  ;;  %v994_v59 = vadd.f32 %v988_v56, %v977_v53  ;;  %v1690_v53 = vld [vmem:[%s3088_s7] ss:$0 sm:$0xff]  ;;  %s3093_s7 = sld [smem:[#allocation41_spill]] }
 0x43f   : > { %v995_v60 = vadd.f32 %v993_v58, %v978_v54  ;;  %v1170_v58 = vsub.s32 0, %v2848_v35  ;;  %v1976_v35 = vld [vmem:[#allocation16] sm:$0xff]  }
 0x440   : > { %v997_v61 = vadd.f32 %v996_v55, %v994_v59 }
 0x441   : > { %v998_v62 = vadd.f32 %v996_v55, %v995_v60 }
 0x442   : > { %v999_v63 = vmax.f32 %v997_v61, 0.0 }
 0x443   : > { %v1000_v1 = vmax.f32 %v998_v62, 0.0 }
 0x445   : > { %v1001_v2 = vpack.c.bf16 %v1000_v1, %v999_v63 }
 0x447   : > { %1792 = vmatmul.mubr.msk.bf16.vlgmr.msra.gmra.mrb[8].mxu0 %vm699_vm1, %v1001_v2 }
 0x448   : > { %1807 = vmatprep.mubr.msk.bf16.mxu0 %vm2346_vm0, %v2345_v0  ;;  %1804 = vmatpush3.bf16.msra.mxu0 %v1976_v35 }
 0x449   : > { %1805 = vmatprep.subr.bf16.mxu0 %v2345_v0 }
 0x499   : > { %v877_v3 = vpop.f32.mrb[4].mxu0 }
 0x49a   : > { %v883_v4 = vadd.f32 %v877_v3, %v2837_v17  ;;  %v1777_v5 = vpop.f32.mrb[5].mxu0  ;;  %v1972_v17 = vld [vmem:[#allocation13] sm:$0xff]  }
 0x49b   : > { %v880_v6 = vpop.f32.mrb[6].mxu0  ;;  %1795 = vmatprep.subr.bf16.mxu1 %v1972_v17 }
 0x49c   : > { %v884_v7 = vsel %vm699_vm1, %v883_v4, 0.0  ;;  %v1778_v8 = vpop.f32.mrb[7].mxu0  ;;  %1796 = vmatpush3.bf16.msra.mxu1 %v1972_v17 }
 0x49d   : > { %v885_v9 = vrot.slane %v884_v7, 4  ;;  %1797 = vmatprep.subr.bf16.mxu1 %v1973_v20 }
 0x49f   : > { %v886_v10 = vadd.f32 %v885_v9, %v884_v7 }
 0x4a0   : > { %1798 = vmatpush3.bf16.msra.mxu1 %v1973_v20 }
 0x4a1   : > { %v887_v11 = vrot.slane %v886_v10, 2  ;;  %1811 = vmatprep.subr.bf16.mxu1 %v2345_v0 }
 0x4a3   : > { %v888_v12 = vadd.f32 %v887_v11, %v886_v10  ;;  %v1977_v11 = vld [vmem:[#allocation16 + $0x8] sm:$0xff]  }
 0x4a4   : > { %1806 = vmatpush3.bf16.msra.mxu0 %v1977_v11 }
 0x4a5   : > { %v889_v13 = vrot.slane %v888_v12, 1  ;;  %1819 = vmatprep.subr.bf16.mxu0 %v2345_v0 }
 0x4a7   : > { %v890_v14 = vadd.f32 %v889_v13, %v888_v12 }
 0x4a9   : > { %v892_v15 = vmul.f32 0.125, %v890_v14 }
 0x4ab   : > { %1080 = vst.msk [vmem:[#allocation2] sm:$0xff] %vm699_vm1, %v892_v15  ;;  %v1196_v52 = vpack.c.bf16 %v892_v15, %v892_v15 }
 0x4b2   : > { %v1083_v45 = vld [vmem:[#allocation2] sm:$0xff] }
 0x51a   : > { %v1039_v16 = vpop.f32.mrb[8].mxu0 }
 0x51b   : > { %1062 = vrot.lane.b32.xlu0 %v1039_v16, %s2348_s11  ;;  %v1793_v18 = vpop.f32.mrb[9].mxu0  ;;  %v1046_v21 = vrot.slane %v1039_v16, 7 }
 0x51c   : > { %v1042_v19 = vpop.f32.mrb[10].mxu0 }
 0x51d   : > { %v1047_v22 = vrot.slane %v1042_v19, 7  ;;  %1064 = vrot.lane.b32.xlu1 %v1042_v19, %s2348_s11  ;;  %v1794_v23 = vpop.f32.mrb[11].mxu0  ;;  %s670_s11 = scalar_lea.vmem [#allocation19], %s2785_s22 }
 0x51e   : > { %s1487_s4 = sshll.u32 %s670_s11, 4  ;;  %s2958_s4 = int_to_ptr.vmem [resolvable:$true] %s1487_s4 }
 0x51f   : > { %1054 = vrot.lane.b32.xlu0 %v1039_v16, %s2347_s2  ;;  %v1049_v24 = vsel %vm961_vm4, %v1047_v22, %v1046_v21  ;;  %v1048_v25 = vsel %vm961_vm4, %v1046_v21, %v1047_v22  ;;  %p2255_p7 = scmp.lt.s32.totalorder %s2958_s4, %s2253_s20 }
 0x520   : > { %v1050_v31 = vsel %vm965_vm5, %v1049_v24, 0.0 }
 0x521   : > { %1056 = vrot.lane.b32.xlu1 %v1042_v19, %s2347_s2  ;;  %s1711_s2 = sshll.u32 %s2454_s25, 4  ;;  %s2248_s25 = scalar_lea.vmem %s2958_s4, 16 }
 0x522   : > { %s2956_s19 = scalar_lea.hbm %s3093_s7, %s1711_s2  ;;  %p2249_p0 = scmp.ne.s32.totalorder %s2958_s4, %s2248_s25 }
 0x523   : > { %p2256_p12 = scmp.lt.s32.totalorder %s2254_s27, %s2248_s25 }
 0x524   : > { %p2250_p8 = pnand %p2249_p0, %p3094_p6 }
 0x525   : > { %p2257_p1 = por %p2256_p12, %p2255_p7 }
 0x526   : > { %p2251_p4 = pneg %p2250_p8 }
 0x528   : > { %p2258_p10 = pnand %p2257_p1, %p2251_p4 }
 0x58d   : > { %v1063_v26 = vpop.permute.xlu0 %1062 }
 0x58e   : > { %v1068_v28 = vrot.slane %v1063_v26, 1 }
 0x58f   : > { %v1065_v27 = vpop.permute.xlu1 %1064 }
 0x590   : > { %v1069_v29 = vrot.slane %v1065_v27, 1 }
 0x591   : > { %v1055_v30 = vpop.permute.xlu0 %1054 }
 0x592   : > { %v1060_v32 = vadd.f32 %v1055_v30, %v1050_v31  ;;  %v1070_v33 = vsel %vm987_vm6, %v1068_v28, %v1069_v29  ;;  %v1071_v34 = vsel %vm987_vm6, %v1069_v29, %v1068_v28  ;;  %v1978_v28 = vld [vmem:[%s3089_s14] sm:$0xff]   ;;  %v1979_v30 = vld [vmem:[%s3089_s14 + $0x8] sm:$0xff]   ;;  %v1980_v31 = vld [vmem:[%s3089_s14 + $0x10] sm:$0xff]  }
 0x593   : > { %v1057_v36 = vpop.permute.xlu1 %1056  ;;  %v1073_v39 = vsel %vm991_vm7, %v1071_v34, 0.0  ;;  %v1983_v34 = vld [vmem:[#allocation18 + $0x8] sm:$0xff]  }
 0x594   : > { %v1074_v37 = vadd.f32 %v1070_v33, %v1060_v32  ;;  %v1061_v38 = vadd.f32 %v1057_v36, %v1048_v25  ;;  %v1981_v32 = vld [vmem:[%s3089_s14 + $0x18] sm:$0xff]   ;;  %v1982_v33 = vld [vmem:[#allocation18] sm:$0xff]   ;;  %v1195_v36 = vld [vmem:[%s3090_s24] sm:$0x1] }
 0x596   : > { %v1076_v40 = vadd.f32 %v1074_v37, %v996_v55  ;;  %v1075_v41 = vadd.f32 %v1073_v39, %v1061_v38 }
 0x598   : > { %v1078_v42 = vmax.f32 %v1076_v40, 0.0  ;;  %v1077_v43 = vadd.f32 %v1075_v41, %v996_v55 }
 0x59a   : > { %1081 = vst.msk [vmem:[#allocation2 + $0x8] sm:$0xff] %vm699_vm1, %v1078_v42  ;;  %v1079_v44 = vmax.f32 %v1077_v43, 0.0 }
 0x59c   : > { %1082 = vst.msk [vmem:[#allocation2 + $0x10] sm:$0xff] %vm699_vm1, %v1079_v44 }
 0x5a1   : > { %v1084_v46 = vld [vmem:[#allocation2 + $0x8] sm:$0xff] }
 0x5a2   : > { %v1086_v48 = vpack.c.bf16 %v1084_v46, %v1083_v45  ;;  %v1984_v45 = vld [vmem:[#allocation18 + $0x10] sm:$0xff]   ;;  %v1985_v46 = vld [vmem:[#allocation18 + $0x18] sm:$0xff]  }
 0x5a3   : > { %v1085_v49 = vld [vmem:[#allocation2 + $0x10] sm:$0xff] }
 0x5a4   : > { %1799 = vmatprep.mubr.msk.bf16.mxu1 %vm699_vm1, %v1086_v48  ;;  %v1087_v51 = vpack.c.bf16 %v1085_v49, %v1085_v49 }
 0x5a6   : > { %1800 = vmatmul.mubr.msk.bf16.vlgmr.msra.gmra.mrb[12].mxu1 %vm699_vm1, %v1087_v51 }
 0x5a7   : > { %1812 = vmatpush3.bf16.msra.mxu1 %v1974_v50  ;;  %1815 = vmatprep.mubr.msk.bf16.mxu1 %vm2346_vm0, %v2345_v0 }
 0x5a8   : > { %1813 = vmatprep.subr.bf16.mxu1 %v2345_v0 }
 0x5ab   : > { %1814 = vmatpush3.bf16.msra.mxu1 %v1975_v47 }
 0x5ac   : > { %1831 = vmatprep.subr.bf16.mxu1 %v2345_v0 }
 0x5ae   : > { %1816 = vmatmul.mubr.msk.bf16.vlgmr.msra.gmra.mrb[16].mxu1 %vm699_vm1, %v1196_v52 }
 0x5af   : > { %1839 = vmatprep.mubr.msk.bf16.mxu1 %vm2346_vm0, %v2345_v0  ;;  %1832 = vmatpush3.bf16.msra.mxu1 %v1982_v33 }
 0x5b0   : > { %1833 = vmatprep.subr.bf16.mxu1 %v2345_v0 }
 0x5b3   : > { %1834 = vmatpush3.bf16.msra.mxu1 %v1983_v34 }
 0x5b4   : > { %1835 = vmatprep.subr.bf16.mxu1 %v2345_v0 }
 0x5b7   : > { %1836 = vmatpush3.bf16.msra.mxu1 %v1984_v45 }
 0x5b8   : > { %1837 = vmatprep.subr.bf16.mxu1 %v2345_v0 }
 0x5bb   : > { %1838 = vmatpush3.bf16.msra.mxu1 %v1985_v46 }
 0x679   : > { %v1801_v54 = vpop.f32.mrb[12].mxu1 }
 0x67a   : > { %v1151_v55 = vpop.f32.mrb[13].mxu1  ;;  %v1160_v56 = vadd.f32 %v1801_v54, %v1690_v53  ;;  %v1405_v54 = vld [vmem:[%s3091_s28] sm:$0x1] }
 0x67b   : > { %v1152_v57 = vadd.f32 %v1690_v53, %v1151_v55  ;;  %v1802_v59 = vpop.f32.mrb[14].mxu1 }
 0x67c   : > { %v1154_v60 = vpop.f32.mrb[15].mxu1  ;;  %v1167_v63 = vmax.f32 %v1160_v56, 0.0 }
 0x67d   : > { %v1165_v61 = vmax.f32 %v1152_v57, 0.0  ;;  %v1155_v62 = vadd.f32 %v1690_v53, %v1154_v60 }
 0x67f   : > { %v1171_v1 = vrot.slane %v1165_v61, %v1170_v58  ;;  %v1166_v2 = vmax.f32 %v1155_v62, 0.0 }
 0x681   : > { %v1310_v3 = vpop.f32.mrb[16].mxu1  ;;  %v1173_v4 = vmul.f32 %v1171_v1, %v1167_v63  ;;  %v1172_v5 = vmul.f32 %v1171_v1, %v1166_v2 }
 0x682   : > { %v1817_v6 = vpop.f32.mrb[17].mxu1 }
 0x683   : > { %v1313_v7 = vpop.f32.mrb[18].mxu1  ;;  %v1177_v8 = vsel %vm699_vm1, %v1173_v4, 0.0  ;;  %v1174_v9 = vsel %vm699_vm1, %v1172_v5, 0.0 }
 0x684   : > { %v1818_v10 = vpop.f32.mrb[19].mxu1  ;;  %1178 = vadd.xlane.f32.xlu1 %v1177_v8  ;;  %1175 = vadd.xlane.f32.xlu0 %v1174_v9 }
 0x711   : > { %v1179_v12 = vpop.xlane.xlu1 %1178  ;;  %v1176_v13 = vpop.xlane.xlu0 %1175 }
 0x712   : > { %1986 = vtanh.f32 %v1179_v12 }
 0x713   : > { %1988 = vtanh.f32 %v1176_v13 }
 0x71c   : > { %v1987_v14 = vpop.eup %1986 }
 0x71d   : > { %v1989_v15 = vpop.eup %1988  ;;  %v1183_v16 = vmul.f32 %v1987_v14, %v1167_v63 }
 0x71e   : > { %v1182_v18 = vmul.f32 %v1989_v15, %v1166_v2 }
 0x71f   : > { %v1185_v19 = vsel %vm699_vm1, %v1183_v16, 0.0 }
 0x720   : > { %v1184_v17 = vsel %vm699_vm1, %v1182_v18, 0.0 }
 0x721   : > { %v1186_v20 = vadd.f32 %v1185_v19, %v1184_v17 }
 0x723   : > { %v1187_v21 = vrot.slane %v1186_v20, 4 }
 0x725   : > { %v1188_v22 = vadd.f32 %v1187_v21, %v1186_v20 }
 0x727   : > { %v1189_v23 = vrot.slane %v1188_v22, 2 }
 0x729   : > { %v1190_v24 = vadd.f32 %v1189_v23, %v1188_v22 }
 0x72b   : > { %v1191_v25 = vrot.slane %v1190_v24, 1 }
 0x72d   : > { %v1192_v26 = vadd.f32 %v1191_v25, %v1190_v24 }
 0x72f   : > { %v1194_v27 = vmul.f32 0.0625, %v1192_v26 }
 0x731   : > { %v1201_v29 = vpack.c.bf16 %v1194_v27, %v1194_v27 }
 0x733   : > { %1808 = vmatmul.mubr.msk.bf16.vlgmr.msra.gmra.mrb[12].mxu0 %vm699_vm1, %v1201_v29 }
 0x734   : > { %1820 = vmatpush3.bf16.msra.mxu0 %v1978_v28  ;;  %1827 = vmatprep.mubr.msk.bf16.mxu0 %vm2346_vm0, %v2345_v0 }
 0x735   : > { %1821 = vmatprep.subr.bf16.mxu0 %v2345_v0 }
 0x738   : > { %1822 = vmatpush3.bf16.msra.mxu0 %v1979_v30 }
 0x739   : > { %1823 = vmatprep.subr.bf16.mxu0 %v2345_v0 }
 0x73c   : > { %1824 = vmatpush3.bf16.msra.mxu0 %v1980_v31 }
 0x73d   : > { %1825 = vmatprep.subr.bf16.mxu0 %v2345_v0 }
 0x740   : > { %1826 = vmatpush3.bf16.msra.mxu0 %v1981_v32 }
 0x806   : > { %v1255_v37 = vpop.f32.mrb[12].mxu0 }
 0x807   : > { %v1311_v38 = vadd.f32 %v1310_v3, %v1255_v37  ;;  %v1809_v39 = vpop.f32.mrb[13].mxu0 }
 0x808   : > { %v1258_v40 = vpop.f32.mrb[14].mxu0 }
 0x809   : > { %v1316_v41 = vadd.f32 %v1311_v38, %v1195_v36  ;;  %v1810_v42 = vpop.f32.mrb[15].mxu0 }
 0x80b   : > { %v1317_v43 = vmax.f32 %v1316_v41, 0.0 }
 0x80d   : > { %v1318_v44 = vpack.c.bf16 %v1317_v43, %v1317_v43 }
 0x80f   : > { %1828 = vmatmul.mubr.msk.bf16.vlgmr.msra.gmra.mrb[16].mxu0 %vm1351_vm8, %v1318_v44 }
 0x8e2   : > { %v1389_v48 = vpop.f32.mrb[16].mxu0 }
 0x8e3   : > { %v1390_v49 = vadd.f32 %v1389_v48, %v1195_v36  ;;  %v1829_v50 = vpop.f32.mrb[17].mxu0 }
 0x8e4   : > { %v1392_v51 = vpop.f32.mrb[18].mxu0 }
 0x8e5   : > { %v1395_v47 = vmax.f32 %v1390_v49, 0.0  ;;  %v1830_v52 = vpop.f32.mrb[19].mxu0 }
 0x8e7   : > { %v1396_v53 = vpack.c.bf16 %v1395_v47, %v1395_v47 }
 0x8e9   : > { %1840 = vmatmul.mubr.msk.bf16.vlgmr.msra.gmra.mrb[20].mxu1 %vm1351_vm8, %v1396_v53 }
 0x9bc   : > { %v1467_v0 = vpop.f32.mrb[20].mxu1 }
 0x9bd   : > { %v1468_v55 = vadd.f32 %v1467_v0, %v1405_v54  ;;  %v1841_v56 = vpop.f32.mrb[21].mxu1 }
 0x9be   : > { %v1470_v57 = vpop.f32.mrb[22].mxu1 }
 0x9bf   : > { %1473 = vst [vmem:[%s670_s11] sm:$0x1] %v1468_v55  ;;  %v1842_v58 = vpop.f32.mrb[23].mxu1 }
 0x9c0   : > { %2261 = shalt.err (!%p2258_p10)
}
 0x9c1   : > { %s2262_s22 = scalar_lea.hbm %s2956_s19, 16  ;;  %s2266_s10 = scalar_lea.hbm %s3093_s7, 32 }
 0x9c2   : > { %p2263_p2 = scmp.ne.s32.totalorder %s2956_s19, %s2262_s22  ;;  %p2267_p9 = scmp.lt.u32.totalorder %s2956_s19, %s3093_s7 }
 0x9c3   : > { %p2268_p11 = scmp.lt.u32.totalorder %s2266_s10, %s2262_s22  ;;  %p2270_p0 = scmp.lt.u32.totalorder %s2262_s22, %s2956_s19 }
 0x9c4   : > { %p2264_p13 = pnand %p2263_p2, %p3094_p6 }
 0x9c5   : > { %p2269_p3 = por %p2268_p11, %p2267_p9 }
 0x9c6   : > { %p2265_p5 = pneg %p2264_p13 }
 0x9c7   : > { %p2271_p8 = por %p2270_p0, %p2269_p3 }
 0x9c9   : > { %p2272_p4 = pnand %p2271_p8, %p2265_p5 }
 0x9cb   : > { %2275 = shalt.err (!%p2272_p4)
}
 0x9cc   : > { %1873 = dma.vmem_to_hbm [thread:$0]  (%p3094_p6), %s2958_s4, 16, %s2956_s19, %s1475_s18  }
 0x9cd PF: > { %s3095_s24 = sld [smem:[#allocation26_spill]]  ;;  %s3096_s29 = sld [smem:[#allocation31_spill]] }
 0x9ce   : > { %p3098_p12 = scmp.ge.s32.totalorder %s2330_s23, 2 }
 0x9d3   : > { %s1499_s16 = sand.u32 1, %s3095_s24   ;;  %p3097_p7 = scmp.ne.s32.totalorder %s3096_s29, 0 }
 0x9d4   : > { %s1500_s28 = scalar_lea.sflag [#allocation6], %s1499_s16 }
 0x9d5   : > { %p1905_p1 = pnand %p3098_p12, %p3097_p7 }
 0x9d7   : > { %2313 = dma.done.wait (!%p1905_p1), %s1500_s28, 16  }
 0x9d8   : > { %2315 = vsyncadd (!%p1905_p1), %s1500_s28, 4294967280  ;;  %s3099_s23 = sld [smem:[#allocation28_spill]]  ;;  %s3100_s2 = sld [smem:[#allocation27_spill]] }
 0x9d9   : > { %s3101_s22 = sld [smem:[#allocation29_spill]]  ;;  %s3102_s20 = smov %s2322_s21 }
 0x9de   : > { %p35_p10 = scmp.ge.s32.totalorder %s3099_s23, 4   ;;  %s3103_s21 = smov %s3100_s2 }
 0x9e0   :  { %37 = sbr.rel (!%p35_p10) target bundleno = 22 (0x16), region = 173 }
 0x9e7   :  { %1504 = vsyncpa [#allocation5], 1 }
 0x9e8   :  { %1506 = vsyncpa [#allocation5 + $0x1], 1 }
 0x9e9   :  { %1507 = vsyncpa [#allocation8], 1 }
 0x9ea   :  { %1509 = vsyncpa [#allocation8 + $0x1], 1 }
 0x9eb   :  { %1510 = vsyncpa [#allocation11], 1 }
 0x9ec   :  { %1511 = vsyncpa [#allocation14], 1 }
 0x9ed   :  { %1512 = vsyncpa [#allocation17], 1 }
 0x9ee   :  { %1513 = vsyncpa [#allocation6], 1 }
 0x9ef   :  { %1515 = vsyncpa [#allocation6 + $0x1], 1 }

</bundles_post_ra>
